<compile_context>
chip_gen: v5e
topology: v5e:2x2
jax: 0.10.0
libtpu: 0.0.40
codegen_flags: <defaults>
</compile_context>

<pallas_src>
import functools

import jax
import jax.numpy as jnp
from jax.experimental import pallas as pl
from jax.experimental.pallas import tpu as pltpu

_LANE = 128
_SUBLANE = 8
_NEG_BIG = -1e30  # finite "-inf": keeps softmax NaN-free even for fully masked rows


def _round_up(x, m):
    return ((x + m - 1) // m) * m


def _pad2(w, rows, cols):
    return jnp.pad(w, ((0, rows - w.shape[0]), (0, cols - w.shape[1])))


# -----------------------------------------------------------------------------
# Fused decode-step kernel.
#   refs layout (inputs):
#     emb (Bp, Ep) bf16 | hid (L, Bp, Hp) f32 | enc (Bp, Sp, Hp) bf16 | len (Bp,) i32 (SMEM)
#     per layer l: wih (3, I, Hp) bf16, whh (3, Hp, Hp) bf16,
#                  b_r, b_z, b_in, b_hn each (1, Hp) f32
#     head: lin_top (Hp, Hp) bf16, lin_bot (Hp, Hp) bf16, lin_b (1, Hp) f32,
#           out_w (Hp, Vp) bf16, out_b (1, Vp) f32
#   outputs: logp (Bp, Vp) f32, new_hid (L, Bp, Hp) f32, attw (Bp, 1, Sp) f32
# -----------------------------------------------------------------------------
def _decoder_step_kernel(num_layers, batch, *refs):
    emb_ref, hid_ref, enc_ref, len_ref = refs[:4]
    lrefs = refs[4:4 + 6 * num_layers]
    (lin_top_ref, lin_bot_ref, lin_b_ref,
     out_w_ref, out_b_ref) = refs[4 + 6 * num_layers:9 + 6 * num_layers]
    logp_ref, newhid_ref, attw_ref = refs[9 + 6 * num_layers:]

    f32 = jnp.float32
    bf16 = jnp.bfloat16
    Bp, Sp, Hp = enc_ref.shape

    # ---- multi-layer GRU step (tgt_len == 1), unrolled over layers ----------
    x = emb_ref[...]                                    # (Bp, Ep) bf16
    h_last = None
    for l in range(num_layers):
        wih, whh, b_r, b_z, b_in, b_hn = lrefs[6 * l:6 * l + 6]
        h = hid_ref[l]                                  # (Bp, Hp) f32
        hb = h.astype(bf16)
        gi_r = jnp.dot(x, wih[0], preferred_element_type=f32)
        gi_z = jnp.dot(x, wih[1], preferred_element_type=f32)
        gi_n = jnp.dot(x, wih[2], preferred_element_type=f32)
        gh_r = jnp.dot(hb, whh[0], preferred_element_type=f32)
        gh_z = jnp.dot(hb, whh[1], preferred_element_type=f32)
        gh_n = jnp.dot(hb, whh[2], preferred_element_type=f32)
        r = jax.nn.sigmoid(gi_r + gh_r + b_r[...])      # b_r = bih_r + bhh_r (folded)
        z = jax.nn.sigmoid(gi_z + gh_z + b_z[...])
        n = jnp.tanh(gi_n + b_in[...] + r * (gh_n + b_hn[...]))
        h_new = (1.0 - z) * n + z * h                   # (Bp, Hp) f32
        newhid_ref[l] = h_new
        h_last = h_new
        x = h_new.astype(bf16)

    # ---- dot-product attention over encoder outputs (MXU) -------------------
    attw_ref[...] = jnp.zeros_like(attw_ref)
    ctx = jnp.zeros((Bp, Hp), f32)
    for b in range(batch):                              # real batch (static, small)
        enc_b = enc_ref[b]                              # (Sp, Hp) bf16
        q_b = h_last[b:b + 1, :].astype(bf16)           # (1, Hp)
        # scores = q_b @ enc_b^T  -> (1, Sp)  (trans-B dot_general on the MXU)
        s_b = jax.lax.dot_general(q_b, enc_b, (((1,), (1,)), ((), ())),
                                  preferred_element_type=f32)
        pos = jax.lax.broadcasted_iota(jnp.int32, (1, Sp), 1)
        s_b = jnp.where(pos < len_ref[b], s_b, f32(_NEG_BIG))
        m_b = jnp.max(s_b, axis=-1, keepdims=True)
        e_b = jnp.exp(s_b - m_b)
        w_b = e_b * pl.reciprocal(jnp.sum(e_b, axis=-1, keepdims=True), approx=True)
        attw_ref[b] = w_b                               # (1, Sp)
        ctx_b = jnp.dot(w_b.astype(bf16), enc_b, preferred_element_type=f32)  # (1, Hp)
        sel = (jax.lax.broadcasted_iota(jnp.int32, (Bp, 1), 0) == b).astype(f32)
        ctx = ctx + sel * ctx_b                         # place row b

    # ---- concat-free head: Linear -> ReLU -> Linear -> LogSoftmax -----------
    out2 = (jnp.dot(h_last.astype(bf16), lin_top_ref[...], preferred_element_type=f32)
            + jnp.dot(ctx.astype(bf16), lin_bot_ref[...], preferred_element_type=f32)
            + lin_b_ref[...])
    out2 = jnp.maximum(out2, 0.0)
    logits = jnp.dot(out2.astype(bf16), out_w_ref[...],
                     preferred_element_type=f32) + out_b_ref[...]
    lm = jnp.max(logits, axis=-1, keepdims=True)
    lse = jnp.log(jnp.sum(jnp.exp(logits - lm), axis=-1, keepdims=True)) + lm
    logp_ref[...] = logits - lse


# -----------------------------------------------------------------------------
# Parameter packing: pad to lane multiples, split GRU gates / linear halves,
# fold biases, cast weights to bf16.
# -----------------------------------------------------------------------------
def pack_params(params, emb_size, hidden_size, vocab_size, num_layers):
    H, E, V = hidden_size, emb_size, vocab_size
    Hp, Ep, Vp = _round_up(H, _LANE), _round_up(E, _LANE), _round_up(V, _LANE)
    packed = dict(E=E, H=H, V=V, L=num_layers, Ep=Ep, Hp=Hp, Vp=Vp)
    packed["embedding"] = _pad2(params["embedding"], V, Ep).astype(jnp.bfloat16)

    layers = []
    for l in range(num_layers):
        wih, whh, bih, bhh = params["gru"][l]
        Ip = Ep if l == 0 else Hp
        wih_g = jnp.stack([_pad2(wih[:, k * H:(k + 1) * H], Ip, Hp) for k in range(3)],
                          axis=0).astype(jnp.bfloat16)
        whh_g = jnp.stack([_pad2(whh[:, k * H:(k + 1) * H], Hp, Hp) for k in range(3)],
                          axis=0).astype(jnp.bfloat16)
        b_r = _pad2(bih[:, 0:H] + bhh[:, 0:H], 1, Hp)
        b_z = _pad2(bih[:, H:2 * H] + bhh[:, H:2 * H], 1, Hp)
        b_in = _pad2(bih[:, 2 * H:3 * H], 1, Hp)
        b_hn = _pad2(bhh[:, 2 * H:3 * H], 1, Hp)
        layers.append((wih_g, whh_g, b_r, b_z, b_in, b_hn))
    packed["gru"] = layers

    packed["lin_top"] = _pad2(params["lin_w"][:H], Hp, Hp).astype(jnp.bfloat16)
    packed["lin_bot"] = _pad2(params["lin_w"][H:], Hp, Hp).astype(jnp.bfloat16)
    packed["lin_b"] = _pad2(params["lin_b"], 1, Hp)
    packed["out_w"] = _pad2(params["out_w"], Hp, Vp).astype(jnp.bfloat16)
    # pad vocab lanes of the output bias with a huge negative so they vanish
    # under the in-kernel log-softmax.
    packed["out_b"] = jnp.full((1, Vp), _NEG_BIG, jnp.float32).at[:, :V].set(params["out_b"])
    return packed


# -----------------------------------------------------------------------------
# Forward wrapper: embedding gather + padding in plain JAX, one pallas_call.
# -----------------------------------------------------------------------------
def decoder_atten_forward(packed, tgt_input, hidden, true_len, encoder_outputs):
    B = tgt_input.shape[0]
    L, H, V = packed["L"], packed["H"], packed["V"]
    Hp, Ep, Vp = packed["Hp"], packed["Ep"], packed["Vp"]
    S = encoder_outputs.shape[1]
    Sp = _round_up(S, _LANE)
    Bp = _round_up(max(B, _SUBLANE), _SUBLANE)

    # embedding lookup (gather) in the wrapper; dropout is identity in eval mode.
    emb = packed["embedding"][tgt_input[:, 0]]                          # (B, Ep) bf16
    emb_p = jnp.zeros((Bp, Ep), jnp.bfloat16).at[:B].set(emb)
    hid_p = jnp.pad(hidden.astype(jnp.float32), ((0, 0), (0, Bp - B), (0, Hp - H)))
    enc_p = jnp.pad(encoder_outputs,
                    ((0, Bp - B), (0, Sp - S), (0, Hp - H))).astype(jnp.bfloat16)
    len_p = jnp.pad(true_len.astype(jnp.int32), (0, Bp - B))            # (Bp,)

    flat_w = []
    for lw in packed["gru"]:
        flat_w.extend(lw)
    flat_w += [packed["lin_top"], packed["lin_bot"], packed["lin_b"],
               packed["out_w"], packed["out_b"]]

    vmem = pl.BlockSpec(memory_space=pltpu.MemorySpace.VMEM)
    smem = pl.BlockSpec(memory_space=pltpu.MemorySpace.SMEM)
    kernel = functools.partial(_decoder_step_kernel, L, B)

    logp, new_hid, attw = pl.pallas_call(
        kernel,
        out_shape=(jax.ShapeDtypeStruct((Bp, Vp), jnp.float32),
                   jax.ShapeDtypeStruct((L, Bp, Hp), jnp.float32),
                   jax.ShapeDtypeStruct((Bp, 1, Sp), jnp.float32)),
        in_specs=[vmem, vmem, vmem, smem] + [vmem] * len(flat_w),
        out_specs=(vmem, vmem, vmem),
        input_output_aliases={1: 1},  # hidden buffer reused for new_hidden
        compiler_params=pltpu.CompilerParams(vmem_limit_bytes=32 * 1024 * 1024),
    )(emb_p, hid_p, enc_p, len_p, *flat_w)

    return (logp[:B, :V], new_hid[:, :B, :H], attw[:B, :, :S], None)


# -----------------------------------------------------------------------------
# Pure-JAX f32 reference (correctness check).
# -----------------------------------------------------------------------------
def decoder_atten_reference(params, tgt_input, hidden, true_len, encoder_outputs):
    emb = params["embedding"][tgt_input[:, 0]]
    x = emb
    new_hidden = []
    for l in range(len(params["gru"])):
        wih, whh, bih, bhh = params["gru"][l]
        h = hidden[l]
        gi = x @ wih + bih
        gh = h @ whh + bhh
        H = h.shape[-1]
        r = jax.nn.sigmoid(gi[:, :H] + gh[:, :H])
        z = jax.nn.sigmoid(gi[:, H:2 * H] + gh[:, H:2 * H])
        n = jnp.tanh(gi[:, 2 * H:] + r * gh[:, 2 * H:])
        x = (1.0 - z) * n + z * h
        new_hidden.append(x)
    q = x
    enc = encoder_outputs
    B, S, H = enc.shape
    scores = jnp.einsum("bh,bsh->bs", q, enc)
    mask = jnp.arange(S)[None, :] < true_len[:, None]
    scores = jnp.where(mask, scores, -jnp.inf)
    w = jax.nn.softmax(scores, axis=-1)
    ctx = jnp.einsum("bs,bsh->bh", w, enc)
    cat = jnp.concatenate([q, ctx], axis=-1)
    out2 = jax.nn.relu(cat @ params["lin_w"] + params["lin_b"])
    logits = out2 @ params["out_w"] + params["out_b"]
    logp = jax.nn.log_softmax(logits, axis=1)
    return logp, jnp.stack(new_hidden, 0), w[:, None, :], None


# -----------------------------------------------------------------------------
# Deterministic parameter construction + example run.
# -----------------------------------------------------------------------------
def make_params(key, emb_size, hidden_size, vocab_size, num_layers):
    ks = jax.random.split(key, 6 + 4 * num_layers)
    scale = 0.1
    params = {
        "embedding": scale * jax.random.normal(ks[0], (vocab_size, emb_size), jnp.float32),
        "lin_w": scale * jax.random.normal(ks[1], (2 * hidden_size, hidden_size), jnp.float32),
        "lin_b": scale * jax.random.normal(ks[2], (1, hidden_size), jnp.float32),
        "out_w": scale * jax.random.normal(ks[3], (hidden_size, vocab_size), jnp.float32),
        "out_b": scale * jax.random.normal(ks[4], (1, vocab_size), jnp.float32),
        "gru": [],
    }
    for l in range(num_layers):
        in_dim = emb_size if l == 0 else hidden_size
        k0, k1, k2, k3 = jax.random.split(ks[6 + l], 4)
        params["gru"].append((
            scale * jax.random.normal(k0, (in_dim, 3 * hidden_size), jnp.float32),
            scale * jax.random.normal(k1, (hidden_size, 3 * hidden_size), jnp.float32),
            scale * jax.random.normal(k2, (1, 3 * hidden_size), jnp.float32),
            scale * jax.random.normal(k3, (1, 3 * hidden_size), jnp.float32),
        ))
    return params


if __name__ == "__main__":
    B, T = 2, 1            # batch, tgt_len (module's .squeeze(1) implies tgt_len == 1)
    E, H, V = 16, 32, 64   # emb_size, hidden_size, vocab_size
    L, S = 2, 8            # num_layers, src_len

    key = jax.random.PRNGKey(0)
    k_par, k_tok, k_hid, k_enc = jax.random.split(key, 4)

    params = make_params(k_par, E, H, V, L)
    packed = pack_params(params, E, H, V, L)

    tgt_input = jax.random.randint(k_tok, (B, T), 0, V, dtype=jnp.int32)
    hidden = 0.1 * jax.random.normal(k_hid, (L, B, H), jnp.float32)
    encoder_outputs = 0.1 * jax.random.normal(k_enc, (B, S, H), jnp.float32)
    true_len = jnp.array([S, 5], dtype=jnp.int32)

    logp, new_hidden, attw, cell = decoder_atten_forward(
        packed, tgt_input, hidden, true_len, encoder_outputs)
    jax.block_until_ready((logp, new_hidden, attw))

    # correctness check against pure-JAX f32 reference (kernel uses bf16 weights)
    r_logp, r_hidden, r_attw, _ = decoder_atten_reference(
        params, tgt_input, hidden, true_len, encoder_outputs)
    assert logp.shape == (B, V) and new_hidden.shape == (L, B, H) and attw.shape == (B, T, S)
    assert jnp.allclose(logp, r_logp, atol=2e-2, rtol=2e-2)
    assert jnp.allclose(new_hidden, r_hidden, atol=2e-2, rtol=2e-2)
    assert jnp.allclose(attw, r_attw, atol=2e-2, rtol=2e-2)
    assert not jnp.any(jnp.isnan(logp)) and not jnp.any(jnp.isnan(attw))

    print("KERNEL_OK")
</pallas_src>

<mosaic_0001>
module attributes {stable_mosaic.version = 11 : i64} {
  func.func @_decoder_step_kernel(%arg0: memref<8x128xbf16, #tpu.memory_space<vmem>>, %arg1: memref<2x8x128xf32, #tpu.memory_space<vmem>>, %arg2: memref<8x128x128xbf16, #tpu.memory_space<vmem>>, %arg3: memref<8xi32, #tpu.memory_space<smem>>, %arg4: memref<3x128x128xbf16, #tpu.memory_space<vmem>>, %arg5: memref<3x128x128xbf16, #tpu.memory_space<vmem>>, %arg6: memref<1x128xf32, #tpu.memory_space<vmem>>, %arg7: memref<1x128xf32, #tpu.memory_space<vmem>>, %arg8: memref<1x128xf32, #tpu.memory_space<vmem>>, %arg9: memref<1x128xf32, #tpu.memory_space<vmem>>, %arg10: memref<3x128x128xbf16, #tpu.memory_space<vmem>>, %arg11: memref<3x128x128xbf16, #tpu.memory_space<vmem>>, %arg12: memref<1x128xf32, #tpu.memory_space<vmem>>, %arg13: memref<1x128xf32, #tpu.memory_space<vmem>>, %arg14: memref<1x128xf32, #tpu.memory_space<vmem>>, %arg15: memref<1x128xf32, #tpu.memory_space<vmem>>, %arg16: memref<128x128xbf16, #tpu.memory_space<vmem>>, %arg17: memref<128x128xbf16, #tpu.memory_space<vmem>>, %arg18: memref<1x128xf32, #tpu.memory_space<vmem>>, %arg19: memref<128x128xbf16, #tpu.memory_space<vmem>>, %arg20: memref<1x128xf32, #tpu.memory_space<vmem>>, %arg21: memref<8x128xf32, #tpu.memory_space<vmem>>, %arg22: memref<2x8x128xf32, #tpu.memory_space<vmem>>, %arg23: memref<8x1x128xf32, #tpu.memory_space<vmem>>) attributes {dimension_semantics = [], scalar_prefetch = 0 : i64, scratch_operands = 0 : i64, tpu.core_type = #tpu.core_type<tc>} {
    %c0 = arith.constant 0 : index
    %c0_0 = arith.constant 0 : index
    %0 = vector.load %arg0[%c0, %c0_0] : memref<8x128xbf16, #tpu.memory_space<vmem>>, vector<8x128xbf16>
    %c0_1 = arith.constant 0 : index
    %c0_2 = arith.constant 0 : index
    %c0_3 = arith.constant 0 : index
    %1 = vector.load %arg1[%c0_1, %c0_2, %c0_3] : memref<2x8x128xf32, #tpu.memory_space<vmem>>, vector<1x8x128xf32>
    %2 = vector.shape_cast %1 : vector<1x8x128xf32> to vector<8x128xf32>
    %3 = arith.truncf %2 : vector<8x128xf32> to vector<8x128xbf16>
    %c0_4 = arith.constant 0 : index
    %c0_5 = arith.constant 0 : index
    %c0_6 = arith.constant 0 : index
    %4 = vector.load %arg4[%c0_4, %c0_5, %c0_6] : memref<3x128x128xbf16, #tpu.memory_space<vmem>>, vector<1x128x128xbf16>
    %5 = vector.shape_cast %4 : vector<1x128x128xbf16> to vector<128x128xbf16>
    %cst = arith.constant dense<0.000000e+00> : vector<8x128xf32>
    %6 = tpu.matmul %0, %5, %cst {dimension_numbers = #tpu.dot_dimension_numbers<[1], [0], [0], [1], [0, 0, 1, 1], [], []>} : vector<8x128xbf16>, vector<128x128xbf16>, vector<8x128xf32> -> vector<8x128xf32>
    %c1 = arith.constant 1 : index
    %c0_7 = arith.constant 0 : index
    %c0_8 = arith.constant 0 : index
    %7 = vector.load %arg4[%c1, %c0_7, %c0_8] : memref<3x128x128xbf16, #tpu.memory_space<vmem>>, vector<1x128x128xbf16>
    %8 = vector.shape_cast %7 : vector<1x128x128xbf16> to vector<128x128xbf16>
    %cst_9 = arith.constant dense<0.000000e+00> : vector<8x128xf32>
    %9 = tpu.matmul %0, %8, %cst_9 {dimension_numbers = #tpu.dot_dimension_numbers<[1], [0], [0], [1], [0, 0, 1, 1], [], []>} : vector<8x128xbf16>, vector<128x128xbf16>, vector<8x128xf32> -> vector<8x128xf32>
    %c2 = arith.constant 2 : index
    %c0_10 = arith.constant 0 : index
    %c0_11 = arith.constant 0 : index
    %10 = vector.load %arg4[%c2, %c0_10, %c0_11] : memref<3x128x128xbf16, #tpu.memory_space<vmem>>, vector<1x128x128xbf16>
    %11 = vector.shape_cast %10 : vector<1x128x128xbf16> to vector<128x128xbf16>
    %cst_12 = arith.constant dense<0.000000e+00> : vector<8x128xf32>
    %12 = tpu.matmul %0, %11, %cst_12 {dimension_numbers = #tpu.dot_dimension_numbers<[1], [0], [0], [1], [0, 0, 1, 1], [], []>} : vector<8x128xbf16>, vector<128x128xbf16>, vector<8x128xf32> -> vector<8x128xf32>
    %c0_13 = arith.constant 0 : index
    %c0_14 = arith.constant 0 : index
    %c0_15 = arith.constant 0 : index
    %13 = vector.load %arg5[%c0_13, %c0_14, %c0_15] : memref<3x128x128xbf16, #tpu.memory_space<vmem>>, vector<1x128x128xbf16>
    %14 = vector.shape_cast %13 : vector<1x128x128xbf16> to vector<128x128xbf16>
    %cst_16 = arith.constant dense<0.000000e+00> : vector<8x128xf32>
    %15 = tpu.matmul %3, %14, %cst_16 {dimension_numbers = #tpu.dot_dimension_numbers<[1], [0], [0], [1], [0, 0, 1, 1], [], []>} : vector<8x128xbf16>, vector<128x128xbf16>, vector<8x128xf32> -> vector<8x128xf32>
    %c1_17 = arith.constant 1 : index
    %c0_18 = arith.constant 0 : index
    %c0_19 = arith.constant 0 : index
    %16 = vector.load %arg5[%c1_17, %c0_18, %c0_19] : memref<3x128x128xbf16, #tpu.memory_space<vmem>>, vector<1x128x128xbf16>
    %17 = vector.shape_cast %16 : vector<1x128x128xbf16> to vector<128x128xbf16>
    %cst_20 = arith.constant dense<0.000000e+00> : vector<8x128xf32>
    %18 = tpu.matmul %3, %17, %cst_20 {dimension_numbers = #tpu.dot_dimension_numbers<[1], [0], [0], [1], [0, 0, 1, 1], [], []>} : vector<8x128xbf16>, vector<128x128xbf16>, vector<8x128xf32> -> vector<8x128xf32>
    %c2_21 = arith.constant 2 : index
    %c0_22 = arith.constant 0 : index
    %c0_23 = arith.constant 0 : index
    %19 = vector.load %arg5[%c2_21, %c0_22, %c0_23] : memref<3x128x128xbf16, #tpu.memory_space<vmem>>, vector<1x128x128xbf16>
    %20 = vector.shape_cast %19 : vector<1x128x128xbf16> to vector<128x128xbf16>
    %cst_24 = arith.constant dense<0.000000e+00> : vector<8x128xf32>
    %21 = tpu.matmul %3, %20, %cst_24 {dimension_numbers = #tpu.dot_dimension_numbers<[1], [0], [0], [1], [0, 0, 1, 1], [], []>} : vector<8x128xbf16>, vector<128x128xbf16>, vector<8x128xf32> -> vector<8x128xf32>
    %22 = arith.addf %6, %15 : vector<8x128xf32>
    %c0_25 = arith.constant 0 : index
    %c0_26 = arith.constant 0 : index
    %23 = vector.load %arg6[%c0_25, %c0_26] : memref<1x128xf32, #tpu.memory_space<vmem>>, vector<1x128xf32>
    %24 = vector.broadcast %23 : vector<1x128xf32> to vector<8x128xf32>
    %25 = arith.addf %22, %24 : vector<8x128xf32>
    %26 = arith.negf %25 : vector<8x128xf32>
    %27 = math.exp %26 : vector<8x128xf32>
    %cst_27 = arith.constant 1.000000e+00 : f32
    %28 = vector.broadcast %cst_27 : f32 to vector<8x128xf32>
    %29 = arith.addf %28, %27 : vector<8x128xf32>
    %30 = arith.divf %28, %29 : vector<8x128xf32>
    %31 = arith.addf %9, %18 : vector<8x128xf32>
    %c0_28 = arith.constant 0 : index
    %c0_29 = arith.constant 0 : index
    %32 = vector.load %arg7[%c0_28, %c0_29] : memref<1x128xf32, #tpu.memory_space<vmem>>, vector<1x128xf32>
    %33 = vector.broadcast %32 : vector<1x128xf32> to vector<8x128xf32>
    %34 = arith.addf %31, %33 : vector<8x128xf32>
    %35 = arith.negf %34 : vector<8x128xf32>
    %36 = math.exp %35 : vector<8x128xf32>
    %cst_30 = arith.constant 1.000000e+00 : f32
    %37 = vector.broadcast %cst_30 : f32 to vector<8x128xf32>
    %38 = arith.addf %37, %36 : vector<8x128xf32>
    %39 = arith.divf %37, %38 : vector<8x128xf32>
    %c0_31 = arith.constant 0 : index
    %c0_32 = arith.constant 0 : index
    %40 = vector.load %arg8[%c0_31, %c0_32] : memref<1x128xf32, #tpu.memory_space<vmem>>, vector<1x128xf32>
    %41 = vector.broadcast %40 : vector<1x128xf32> to vector<8x128xf32>
    %42 = arith.addf %12, %41 : vector<8x128xf32>
    %c0_33 = arith.constant 0 : index
    %c0_34 = arith.constant 0 : index
    %43 = vector.load %arg9[%c0_33, %c0_34] : memref<1x128xf32, #tpu.memory_space<vmem>>, vector<1x128xf32>
    %44 = vector.broadcast %43 : vector<1x128xf32> to vector<8x128xf32>
    %45 = arith.addf %21, %44 : vector<8x128xf32>
    %46 = arith.mulf %30, %45 : vector<8x128xf32>
    %47 = arith.addf %42, %46 : vector<8x128xf32>
    %48 = math.tanh %47 : vector<8x128xf32>
    %cst_35 = arith.constant 1.000000e+00 : f32
    %49 = vector.broadcast %cst_35 : f32 to vector<8x128xf32>
    %50 = arith.subf %49, %39 : vector<8x128xf32>
    %51 = arith.mulf %50, %48 : vector<8x128xf32>
    %52 = arith.mulf %39, %2 : vector<8x128xf32>
    %53 = arith.addf %51, %52 : vector<8x128xf32>
    %c0_36 = arith.constant 0 : index
    %c0_37 = arith.constant 0 : index
    %c0_38 = arith.constant 0 : index
    %54 = vector.load %arg22[%c0_36, %c0_37, %c0_38] : memref<2x8x128xf32, #tpu.memory_space<vmem>>, vector<1x8x128xf32>
    %55 = vector.shape_cast %54 : vector<1x8x128xf32> to vector<8x128xf32>
    %56 = vector.shape_cast %53 : vector<8x128xf32> to vector<1x8x128xf32>
    tpu.vector_store %arg22[%c0_36, %c0_37, %c0_38], %56 {strides = array<i32>} : memref<2x8x128xf32, #tpu.memory_space<vmem>>, vector<1x8x128xf32>,
    %57 = arith.truncf %53 : vector<8x128xf32> to vector<8x128xbf16>
    %c1_39 = arith.constant 1 : index
    %c0_40 = arith.constant 0 : index
    %c0_41 = arith.constant 0 : index
    %58 = vector.load %arg1[%c1_39, %c0_40, %c0_41] : memref<2x8x128xf32, #tpu.memory_space<vmem>>, vector<1x8x128xf32>
    %59 = vector.shape_cast %58 : vector<1x8x128xf32> to vector<8x128xf32>
    %60 = arith.truncf %59 : vector<8x128xf32> to vector<8x128xbf16>
    %c0_42 = arith.constant 0 : index
    %c0_43 = arith.constant 0 : index
    %c0_44 = arith.constant 0 : index
    %61 = vector.load %arg10[%c0_42, %c0_43, %c0_44] : memref<3x128x128xbf16, #tpu.memory_space<vmem>>, vector<1x128x128xbf16>
    %62 = vector.shape_cast %61 : vector<1x128x128xbf16> to vector<128x128xbf16>
    %cst_45 = arith.constant dense<0.000000e+00> : vector<8x128xf32>
    %63 = tpu.matmul %57, %62, %cst_45 {dimension_numbers = #tpu.dot_dimension_numbers<[1], [0], [0], [1], [0, 0, 1, 1], [], []>} : vector<8x128xbf16>, vector<128x128xbf16>, vector<8x128xf32> -> vector<8x128xf32>
    %c1_46 = arith.constant 1 : index
    %c0_47 = arith.constant 0 : index
    %c0_48 = arith.constant 0 : index
    %64 = vector.load %arg10[%c1_46, %c0_47, %c0_48] : memref<3x128x128xbf16, #tpu.memory_space<vmem>>, vector<1x128x128xbf16>
    %65 = vector.shape_cast %64 : vector<1x128x128xbf16> to vector<128x128xbf16>
    %cst_49 = arith.constant dense<0.000000e+00> : vector<8x128xf32>
    %66 = tpu.matmul %57, %65, %cst_49 {dimension_numbers = #tpu.dot_dimension_numbers<[1], [0], [0], [1], [0, 0, 1, 1], [], []>} : vector<8x128xbf16>, vector<128x128xbf16>, vector<8x128xf32> -> vector<8x128xf32>
    %c2_50 = arith.constant 2 : index
    %c0_51 = arith.constant 0 : index
    %c0_52 = arith.constant 0 : index
    %67 = vector.load %arg10[%c2_50, %c0_51, %c0_52] : memref<3x128x128xbf16, #tpu.memory_space<vmem>>, vector<1x128x128xbf16>
    %68 = vector.shape_cast %67 : vector<1x128x128xbf16> to vector<128x128xbf16>
    %cst_53 = arith.constant dense<0.000000e+00> : vector<8x128xf32>
    %69 = tpu.matmul %57, %68, %cst_53 {dimension_numbers = #tpu.dot_dimension_numbers<[1], [0], [0], [1], [0, 0, 1, 1], [], []>} : vector<8x128xbf16>, vector<128x128xbf16>, vector<8x128xf32> -> vector<8x128xf32>
    %c0_54 = arith.constant 0 : index
    %c0_55 = arith.constant 0 : index
    %c0_56 = arith.constant 0 : index
    %70 = vector.load %arg11[%c0_54, %c0_55, %c0_56] : memref<3x128x128xbf16, #tpu.memory_space<vmem>>, vector<1x128x128xbf16>
    %71 = vector.shape_cast %70 : vector<1x128x128xbf16> to vector<128x128xbf16>
    %cst_57 = arith.constant dense<0.000000e+00> : vector<8x128xf32>
    %72 = tpu.matmul %60, %71, %cst_57 {dimension_numbers = #tpu.dot_dimension_numbers<[1], [0], [0], [1], [0, 0, 1, 1], [], []>} : vector<8x128xbf16>, vector<128x128xbf16>, vector<8x128xf32> -> vector<8x128xf32>
    %c1_58 = arith.constant 1 : index
    %c0_59 = arith.constant 0 : index
    %c0_60 = arith.constant 0 : index
    %73 = vector.load %arg11[%c1_58, %c0_59, %c0_60] : memref<3x128x128xbf16, #tpu.memory_space<vmem>>, vector<1x128x128xbf16>
    %74 = vector.shape_cast %73 : vector<1x128x128xbf16> to vector<128x128xbf16>
    %cst_61 = arith.constant dense<0.000000e+00> : vector<8x128xf32>
    %75 = tpu.matmul %60, %74, %cst_61 {dimension_numbers = #tpu.dot_dimension_numbers<[1], [0], [0], [1], [0, 0, 1, 1], [], []>} : vector<8x128xbf16>, vector<128x128xbf16>, vector<8x128xf32> -> vector<8x128xf32>
    %c2_62 = arith.constant 2 : index
    %c0_63 = arith.constant 0 : index
    %c0_64 = arith.constant 0 : index
    %76 = vector.load %arg11[%c2_62, %c0_63, %c0_64] : memref<3x128x128xbf16, #tpu.memory_space<vmem>>, vector<1x128x128xbf16>
    %77 = vector.shape_cast %76 : vector<1x128x128xbf16> to vector<128x128xbf16>
    %cst_65 = arith.constant dense<0.000000e+00> : vector<8x128xf32>
    %78 = tpu.matmul %60, %77, %cst_65 {dimension_numbers = #tpu.dot_dimension_numbers<[1], [0], [0], [1], [0, 0, 1, 1], [], []>} : vector<8x128xbf16>, vector<128x128xbf16>, vector<8x128xf32> -> vector<8x128xf32>
    %79 = arith.addf %63, %72 : vector<8x128xf32>
    %c0_66 = arith.constant 0 : index
    %c0_67 = arith.constant 0 : index
    %80 = vector.load %arg12[%c0_66, %c0_67] : memref<1x128xf32, #tpu.memory_space<vmem>>, vector<1x128xf32>
    %81 = vector.broadcast %80 : vector<1x128xf32> to vector<8x128xf32>
    %82 = arith.addf %79, %81 : vector<8x128xf32>
    %83 = arith.negf %82 : vector<8x128xf32>
    %84 = math.exp %83 : vector<8x128xf32>
    %cst_68 = arith.constant 1.000000e+00 : f32
    %85 = vector.broadcast %cst_68 : f32 to vector<8x128xf32>
    %86 = arith.addf %85, %84 : vector<8x128xf32>
    %87 = arith.divf %85, %86 : vector<8x128xf32>
    %88 = arith.addf %66, %75 : vector<8x128xf32>
    %c0_69 = arith.constant 0 : index
    %c0_70 = arith.constant 0 : index
    %89 = vector.load %arg13[%c0_69, %c0_70] : memref<1x128xf32, #tpu.memory_space<vmem>>, vector<1x128xf32>
    %90 = vector.broadcast %89 : vector<1x128xf32> to vector<8x128xf32>
    %91 = arith.addf %88, %90 : vector<8x128xf32>
    %92 = arith.negf %91 : vector<8x128xf32>
    %93 = math.exp %92 : vector<8x128xf32>
    %cst_71 = arith.constant 1.000000e+00 : f32
    %94 = vector.broadcast %cst_71 : f32 to vector<8x128xf32>
    %95 = arith.addf %94, %93 : vector<8x128xf32>
    %96 = arith.divf %94, %95 : vector<8x128xf32>
    %c0_72 = arith.constant 0 : index
    %c0_73 = arith.constant 0 : index
    %97 = vector.load %arg14[%c0_72, %c0_73] : memref<1x128xf32, #tpu.memory_space<vmem>>, vector<1x128xf32>
    %98 = vector.broadcast %97 : vector<1x128xf32> to vector<8x128xf32>
    %99 = arith.addf %69, %98 : vector<8x128xf32>
    %c0_74 = arith.constant 0 : index
    %c0_75 = arith.constant 0 : index
    %100 = vector.load %arg15[%c0_74, %c0_75] : memref<1x128xf32, #tpu.memory_space<vmem>>, vector<1x128xf32>
    %101 = vector.broadcast %100 : vector<1x128xf32> to vector<8x128xf32>
    %102 = arith.addf %78, %101 : vector<8x128xf32>
    %103 = arith.mulf %87, %102 : vector<8x128xf32>
    %104 = arith.addf %99, %103 : vector<8x128xf32>
    %105 = math.tanh %104 : vector<8x128xf32>
    %cst_76 = arith.constant 1.000000e+00 : f32
    %106 = vector.broadcast %cst_76 : f32 to vector<8x128xf32>
    %107 = arith.subf %106, %96 : vector<8x128xf32>
    %108 = arith.mulf %107, %105 : vector<8x128xf32>
    %109 = arith.mulf %96, %59 : vector<8x128xf32>
    %110 = arith.addf %108, %109 : vector<8x128xf32>
    %c1_77 = arith.constant 1 : index
    %c0_78 = arith.constant 0 : index
    %c0_79 = arith.constant 0 : index
    %111 = vector.load %arg22[%c1_77, %c0_78, %c0_79] : memref<2x8x128xf32, #tpu.memory_space<vmem>>, vector<1x8x128xf32>
    %112 = vector.shape_cast %111 : vector<1x8x128xf32> to vector<8x128xf32>
    %113 = vector.shape_cast %110 : vector<8x128xf32> to vector<1x8x128xf32>
    tpu.vector_store %arg22[%c1_77, %c0_78, %c0_79], %113 {strides = array<i32>} : memref<2x8x128xf32, #tpu.memory_space<vmem>>, vector<1x8x128xf32>,
    %cst_80 = arith.constant 0.000000e+00 : f32
    %114 = vector.broadcast %cst_80 : f32 to vector<8x1x128xf32>
    %c0_81 = arith.constant 0 : index
    %c0_82 = arith.constant 0 : index
    %c0_83 = arith.constant 0 : index
    %115 = vector.load %arg23[%c0_81, %c0_82, %c0_83] : memref<8x1x128xf32, #tpu.memory_space<vmem>>, vector<8x1x128xf32>
    tpu.vector_store %arg23[%c0_81, %c0_82, %c0_83], %114 {strides = array<i32>} : memref<8x1x128xf32, #tpu.memory_space<vmem>>, vector<8x1x128xf32>,
    %cst_84 = arith.constant 0.000000e+00 : f32
    %116 = vector.broadcast %cst_84 : f32 to vector<8x128xf32>
    %c0_85 = arith.constant 0 : index
    %c0_86 = arith.constant 0 : index
    %c0_87 = arith.constant 0 : index
    %117 = vector.load %arg2[%c0_85, %c0_86, %c0_87] : memref<8x128x128xbf16, #tpu.memory_space<vmem>>, vector<1x128x128xbf16>
    %118 = vector.shape_cast %117 : vector<1x128x128xbf16> to vector<128x128xbf16>
    %119 = vector.extract_strided_slice %110 {offsets = [0, 0], sizes = [1, 128], strides = [1, 1]} : vector<8x128xf32> to vector<1x128xf32>
    %120 = arith.truncf %119 : vector<1x128xf32> to vector<1x128xbf16>
    %cst_88 = arith.constant dense<0.000000e+00> : vector<1x128xf32>
    %121 = tpu.matmul %120, %118, %cst_88 {dimension_numbers = #tpu.dot_dimension_numbers<[1], [1], [0], [0], [0, 0, 1, 0], [], []>} : vector<1x128xbf16>, vector<128x128xbf16>, vector<1x128xf32> -> vector<1x128xf32>
    %122 = tpu.iota {dimensions = array<i32: 1>} : vector<1x128xi32>
    %c0_89 = arith.constant 0 : index
    %123 = memref.load %arg3[%c0_89] : memref<8xi32, #tpu.memory_space<smem>>
    %124 = vector.broadcast %123 : i32 to vector<1x128xi32>
    %125 = arith.cmpi slt, %122, %124 : vector<1x128xi32>
    %cst_90 = arith.constant -1.000000e+30 : f32
    %126 = vector.broadcast %cst_90 : f32 to vector<1x128xf32>
    %127 = arith.select %125, %121, %126 : vector<1x128xi1>, vector<1x128xf32>
    %cst_91 = arith.constant dense<0xFF800000> : vector<1xf32>
    %128 = vector.multi_reduction <maximumf>, %127, %cst_91 [1] : vector<1x128xf32> to vector<1xf32>
    %129 = vector.shape_cast %128 : vector<1xf32> to vector<1x1xf32>
    %130 = vector.broadcast %129 : vector<1x1xf32> to vector<1x128xf32>
    %131 = arith.subf %127, %130 : vector<1x128xf32>
    %132 = math.exp %131 : vector<1x128xf32>
    %cst_92 = arith.constant dense<0.000000e+00> : vector<1xf32>
    %133 = vector.multi_reduction <add>, %132, %cst_92 [1] : vector<1x128xf32> to vector<1xf32>
    %134 = vector.shape_cast %133 : vector<1xf32> to vector<1x1xf32>
    %135 = tpu.reciprocal %134 {approx = true} : vector<1x1xf32> -> vector<1x1xf32>
    %136 = vector.broadcast %135 : vector<1x1xf32> to vector<1x128xf32>
    %137 = arith.mulf %132, %136 : vector<1x128xf32>
    %c0_93 = arith.constant 0 : index
    %c0_94 = arith.constant 0 : index
    %c0_95 = arith.constant 0 : index
    %138 = vector.load %arg23[%c0_93, %c0_94, %c0_95] : memref<8x1x128xf32, #tpu.memory_space<vmem>>, vector<1x1x128xf32>
    %139 = vector.shape_cast %138 : vector<1x1x128xf32> to vector<1x128xf32>
    %140 = vector.shape_cast %137 : vector<1x128xf32> to vector<1x1x128xf32>
    tpu.vector_store %arg23[%c0_93, %c0_94, %c0_95], %140 {strides = array<i32>} : memref<8x1x128xf32, #tpu.memory_space<vmem>>, vector<1x1x128xf32>,
    %141 = arith.truncf %137 : vector<1x128xf32> to vector<1x128xbf16>
    %cst_96 = arith.constant dense<0.000000e+00> : vector<1x128xf32>
    %142 = tpu.matmul %141, %118, %cst_96 {dimension_numbers = #tpu.dot_dimension_numbers<[1], [0], [0], [1], [0, 0, 1, 1], [], []>} : vector<1x128xbf16>, vector<128x128xbf16>, vector<1x128xf32> -> vector<1x128xf32>
    %143 = tpu.iota {dimensions = array<i32: 0>} : vector<8x1xi32>
    %c0_i32 = arith.constant 0 : i32
    %144 = vector.broadcast %c0_i32 : i32 to vector<8x1xi32>
    %145 = arith.cmpi eq, %143, %144 : vector<8x1xi32>
    %146 = arith.extui %145 : vector<8x1xi1> to vector<8x1xi32>
    %147 = arith.sitofp %146 : vector<8x1xi32> to vector<8x1xf32>
    %148 = vector.broadcast %147 : vector<8x1xf32> to vector<8x128xf32>
    %149 = vector.broadcast %142 : vector<1x128xf32> to vector<8x128xf32>
    %150 = arith.mulf %148, %149 : vector<8x128xf32>
    %151 = arith.addf %116, %150 : vector<8x128xf32>
    %c1_97 = arith.constant 1 : index
    %c0_98 = arith.constant 0 : index
    %c0_99 = arith.constant 0 : index
    %152 = vector.load %arg2[%c1_97, %c0_98, %c0_99] : memref<8x128x128xbf16, #tpu.memory_space<vmem>>, vector<1x128x128xbf16>
    %153 = vector.shape_cast %152 : vector<1x128x128xbf16> to vector<128x128xbf16>
    %154 = vector.extract_strided_slice %110 {offsets = [1, 0], sizes = [1, 128], strides = [1, 1]} : vector<8x128xf32> to vector<1x128xf32>
    %155 = arith.truncf %154 : vector<1x128xf32> to vector<1x128xbf16>
    %cst_100 = arith.constant dense<0.000000e+00> : vector<1x128xf32>
    %156 = tpu.matmul %155, %153, %cst_100 {dimension_numbers = #tpu.dot_dimension_numbers<[1], [1], [0], [0], [0, 0, 1, 0], [], []>} : vector<1x128xbf16>, vector<128x128xbf16>, vector<1x128xf32> -> vector<1x128xf32>
    %157 = tpu.iota {dimensions = array<i32: 1>} : vector<1x128xi32>
    %c1_101 = arith.constant 1 : index
    %158 = memref.load %arg3[%c1_101] : memref<8xi32, #tpu.memory_space<smem>>
    %159 = vector.broadcast %158 : i32 to vector<1x128xi32>
    %160 = arith.cmpi slt, %157, %159 : vector<1x128xi32>
    %cst_102 = arith.constant -1.000000e+30 : f32
    %161 = vector.broadcast %cst_102 : f32 to vector<1x128xf32>
    %162 = arith.select %160, %156, %161 : vector<1x128xi1>, vector<1x128xf32>
    %cst_103 = arith.constant dense<0xFF800000> : vector<1xf32>
    %163 = vector.multi_reduction <maximumf>, %162, %cst_103 [1] : vector<1x128xf32> to vector<1xf32>
    %164 = vector.shape_cast %163 : vector<1xf32> to vector<1x1xf32>
    %165 = vector.broadcast %164 : vector<1x1xf32> to vector<1x128xf32>
    %166 = arith.subf %162, %165 : vector<1x128xf32>
    %167 = math.exp %166 : vector<1x128xf32>
    %cst_104 = arith.constant dense<0.000000e+00> : vector<1xf32>
    %168 = vector.multi_reduction <add>, %167, %cst_104 [1] : vector<1x128xf32> to vector<1xf32>
    %169 = vector.shape_cast %168 : vector<1xf32> to vector<1x1xf32>
    %170 = tpu.reciprocal %169 {approx = true} : vector<1x1xf32> -> vector<1x1xf32>
    %171 = vector.broadcast %170 : vector<1x1xf32> to vector<1x128xf32>
    %172 = arith.mulf %167, %171 : vector<1x128xf32>
    %c1_105 = arith.constant 1 : index
    %c0_106 = arith.constant 0 : index
    %c0_107 = arith.constant 0 : index
    %173 = vector.load %arg23[%c1_105, %c0_106, %c0_107] : memref<8x1x128xf32, #tpu.memory_space<vmem>>, vector<1x1x128xf32>
    %174 = vector.shape_cast %173 : vector<1x1x128xf32> to vector<1x128xf32>
    %175 = vector.shape_cast %172 : vector<1x128xf32> to vector<1x1x128xf32>
    tpu.vector_store %arg23[%c1_105, %c0_106, %c0_107], %175 {strides = array<i32>} : memref<8x1x128xf32, #tpu.memory_space<vmem>>, vector<1x1x128xf32>,
    %176 = arith.truncf %172 : vector<1x128xf32> to vector<1x128xbf16>
    %cst_108 = arith.constant dense<0.000000e+00> : vector<1x128xf32>
    %177 = tpu.matmul %176, %153, %cst_108 {dimension_numbers = #tpu.dot_dimension_numbers<[1], [0], [0], [1], [0, 0, 1, 1], [], []>} : vector<1x128xbf16>, vector<128x128xbf16>, vector<1x128xf32> -> vector<1x128xf32>
    %178 = tpu.iota {dimensions = array<i32: 0>} : vector<8x1xi32>
    %c1_i32 = arith.constant 1 : i32
    %179 = vector.broadcast %c1_i32 : i32 to vector<8x1xi32>
    %180 = arith.cmpi eq, %178, %179 : vector<8x1xi32>
    %181 = arith.extui %180 : vector<8x1xi1> to vector<8x1xi32>
    %182 = arith.sitofp %181 : vector<8x1xi32> to vector<8x1xf32>
    %183 = vector.broadcast %182 : vector<8x1xf32> to vector<8x128xf32>
    %184 = vector.broadcast %177 : vector<1x128xf32> to vector<8x128xf32>
    %185 = arith.mulf %183, %184 : vector<8x128xf32>
    %186 = arith.addf %151, %185 : vector<8x128xf32>
    %187 = arith.truncf %110 : vector<8x128xf32> to vector<8x128xbf16>
    %c0_109 = arith.constant 0 : index
    %c0_110 = arith.constant 0 : index
    %188 = vector.load %arg16[%c0_109, %c0_110] : memref<128x128xbf16, #tpu.memory_space<vmem>>, vector<128x128xbf16>
    %cst_111 = arith.constant dense<0.000000e+00> : vector<8x128xf32>
    %189 = tpu.matmul %187, %188, %cst_111 {dimension_numbers = #tpu.dot_dimension_numbers<[1], [0], [0], [1], [0, 0, 1, 1], [], []>} : vector<8x128xbf16>, vector<128x128xbf16>, vector<8x128xf32> -> vector<8x128xf32>
    %190 = arith.truncf %186 : vector<8x128xf32> to vector<8x128xbf16>
    %c0_112 = arith.constant 0 : index
    %c0_113 = arith.constant 0 : index
    %191 = vector.load %arg17[%c0_112, %c0_113] : memref<128x128xbf16, #tpu.memory_space<vmem>>, vector<128x128xbf16>
    %cst_114 = arith.constant dense<0.000000e+00> : vector<8x128xf32>
    %192 = tpu.matmul %190, %191, %cst_114 {dimension_numbers = #tpu.dot_dimension_numbers<[1], [0], [0], [1], [0, 0, 1, 1], [], []>} : vector<8x128xbf16>, vector<128x128xbf16>, vector<8x128xf32> -> vector<8x128xf32>
    %193 = arith.addf %189, %192 : vector<8x128xf32>
    %c0_115 = arith.constant 0 : index
    %c0_116 = arith.constant 0 : index
    %194 = vector.load %arg18[%c0_115, %c0_116] : memref<1x128xf32, #tpu.memory_space<vmem>>, vector<1x128xf32>
    %195 = vector.broadcast %194 : vector<1x128xf32> to vector<8x128xf32>
    %196 = arith.addf %193, %195 : vector<8x128xf32>
    %cst_117 = arith.constant 0.000000e+00 : f32
    %197 = vector.broadcast %cst_117 : f32 to vector<8x128xf32>
    %198 = arith.maximumf %196, %197 : vector<8x128xf32>
    %199 = arith.truncf %198 : vector<8x128xf32> to vector<8x128xbf16>
    %c0_118 = arith.constant 0 : index
    %c0_119 = arith.constant 0 : index
    %200 = vector.load %arg19[%c0_118, %c0_119] : memref<128x128xbf16, #tpu.memory_space<vmem>>, vector<128x128xbf16>
    %cst_120 = arith.constant dense<0.000000e+00> : vector<8x128xf32>
    %201 = tpu.matmul %199, %200, %cst_120 {dimension_numbers = #tpu.dot_dimension_numbers<[1], [0], [0], [1], [0, 0, 1, 1], [], []>} : vector<8x128xbf16>, vector<128x128xbf16>, vector<8x128xf32> -> vector<8x128xf32>
    %c0_121 = arith.constant 0 : index
    %c0_122 = arith.constant 0 : index
    %202 = vector.load %arg20[%c0_121, %c0_122] : memref<1x128xf32, #tpu.memory_space<vmem>>, vector<1x128xf32>
    %203 = vector.broadcast %202 : vector<1x128xf32> to vector<8x128xf32>
    %204 = arith.addf %201, %203 : vector<8x128xf32>
    %cst_123 = arith.constant dense<0xFF800000> : vector<8xf32>
    %205 = vector.multi_reduction <maximumf>, %204, %cst_123 [1] : vector<8x128xf32> to vector<8xf32>
    %206 = vector.shape_cast %205 : vector<8xf32> to vector<8x1xf32>
    %207 = vector.broadcast %206 : vector<8x1xf32> to vector<8x128xf32>
    %208 = arith.subf %204, %207 : vector<8x128xf32>
    %209 = math.exp %208 : vector<8x128xf32>
    %cst_124 = arith.constant dense<0.000000e+00> : vector<8xf32>
    %210 = vector.multi_reduction <add>, %209, %cst_124 [1] : vector<8x128xf32> to vector<8xf32>
    %211 = vector.shape_cast %210 : vector<8xf32> to vector<8x1xf32>
    %212 = math.log %211 : vector<8x1xf32>
    %213 = arith.addf %212, %206 : vector<8x1xf32>
    %214 = vector.broadcast %213 : vector<8x1xf32> to vector<8x128xf32>
    %215 = arith.subf %204, %214 : vector<8x128xf32>
    %c0_125 = arith.constant 0 : index
    %c0_126 = arith.constant 0 : index
    %216 = vector.load %arg21[%c0_125, %c0_126] : memref<8x128xf32, #tpu.memory_space<vmem>>, vector<8x128xf32>
    tpu.vector_store %arg21[%c0_125, %c0_126], %215 {strides = array<i32>} : memref<8x128xf32, #tpu.memory_space<vmem>>, vector<8x128xf32>,
    return
  }
}

</mosaic_0001>

<bundles_post_ra>
// kernel: tpu_custom_call.1
= control target key start
LH: loop header
LB: loop body
LE: loop exit
PB: predicated region body
PF: predicated region fallthrough
CT: control target
= control target key end

     0   :  { %s3197_s0 = inlined_call_operand.vmem [shape: bf16[8,128], index: 0, kind: input, shape index: {}]   ;;  %s3198_s1 = inlined_call_operand.hbm [shape: f32[2,8,128], index: 1, kind: input, shape index: {}, may-alias: {1,22}]   ;;  %s3199_s2 = inlined_call_operand.hbm [shape: bf16[8,128,128], index: 2, kind: input, shape index: {}]   ;;  %s3200_s3 = inlined_call_operand.vmem [shape: s32[8], index: 3, kind: input, shape index: {}]   ;;  %s3201_s4 = inlined_call_operand.hbm [shape: bf16[3,128,128], index: 4, kind: input, shape index: {}]   ;;  %s3202_s5 = inlined_call_operand.hbm [shape: bf16[3,128,128], index: 5, kind: input, shape index: {}]   ;;  %s3203_s6 = inlined_call_operand.vmem [shape: f32[1,128], index: 6, kind: input, shape index: {}]   ;;  %s3204_s7 = inlined_call_operand.vmem [shape: f32[1,128], index: 7, kind: input, shape index: {}]   ;;  %s3205_s8 = inlined_call_operand.vmem [shape: f32[1,128], index: 8, kind: input, shape index: {}]   ;;  %s3206_s9 = inlined_call_operand.vmem [shape: f32[1,128], index: 9, kind: input, shape index: {}]   ;;  %s3207_s10 = inlined_call_operand.hbm [shape: bf16[3,128,128], index: 10, kind: input, shape index: {}]   ;;  %s3208_s11 = inlined_call_operand.hbm [shape: bf16[3,128,128], index: 11, kind: input, shape index: {}]   ;;  %s3209_s12 = inlined_call_operand.vmem [shape: f32[1,128], index: 12, kind: input, shape index: {}]   ;;  %s3210_s13 = inlined_call_operand.vmem [shape: f32[1,128], index: 13, kind: input, shape index: {}]   ;;  %s3211_s14 = inlined_call_operand.vmem [shape: f32[1,128], index: 14, kind: input, shape index: {}]   ;;  %s3212_s15 = inlined_call_operand.vmem [shape: f32[1,128], index: 15, kind: input, shape index: {}]   ;;  %s3213_s16 = inlined_call_operand.hbm [shape: bf16[128,128], index: 16, kind: input, shape index: {}]   ;;  %s3214_s17 = inlined_call_operand.hbm [shape: bf16[128,128], index: 17, kind: input, shape index: {}]   ;;  %s3215_s18 = inlined_call_operand.vmem [shape: f32[1,128], index: 18, kind: input, shape index: {}]   ;;  %s3216_s19 = inlined_call_operand.hbm [shape: bf16[128,128], index: 19, kind: input, shape index: {}]   ;;  %s3217_s20 = inlined_call_operand.vmem [shape: f32[1,128], index: 20, kind: input, shape index: {}]   ;;  %s3218_s21 = inlined_call_operand.hbm [shape: f32[8,128], index: 21, kind: output, shape index: {0}]   ;;  %s3219_s22 = inlined_call_operand.hbm [shape: f32[2,8,128], index: 22, kind: output, shape index: {1}, may-alias: {1,22}]   ;;  %s3220_s23 = inlined_call_operand.hbm [shape: f32[8,1,128], index: 23, kind: output, shape index: {2}]  }
   0x1   :  { %3223 = sst [smem:[#allocation32_spill]] %s3197_s0 }
   0x2   :  { %3224 = sst [smem:[#allocation33_spill]] %s3198_s1 }
   0x3   :  { %3225 = sst [smem:[#allocation34_spill]] %s3199_s2 }
   0x4   :  { %3226 = sst [smem:[#allocation35_spill]] %s3200_s3 }
   0x5   :  { %3227 = sst [smem:[#allocation36_spill]] %s3201_s4 }
   0x6   :  { %3228 = sst [smem:[#allocation37_spill]] %s3202_s5 }
   0x7   :  { %3229 = sst [smem:[#allocation38_spill]] %s3203_s6 }
   0x8   :  { %3230 = sst [smem:[#allocation39_spill]] %s3204_s7 }
   0x9   :  { %29 = vsyncpa [#allocation3], 0 }
   0xa   :  { %30 = vsyncpa [#allocation7], 0 }
   0xb   :  { %31 = vsyncpa [#allocation5], 0 }
   0xc   :  { %32 = vsyncpa [#allocation11], 0 }
   0xd   :  { %33 = vsyncpa [#allocation14], 0 }
   0xe   :  { %34 = vsyncpa [#allocation17], 0 }
   0xf   :  { %35 = vsyncpa [#allocation4], 0  ;;  %s3231_s24 = sld [smem:[#allocation34_spill]] }
  0x15   :  { %s56_s25 = sshll.u32 %s3231_s24, 4  ;;  %s57_s25 = int_to_ptr.hbm [resolvable:$true] %s56_s25 }
  0x16   :  { %36 = vsyncpa [#allocation21], 0  ;;  %s2919_s5 = smov [#allocation6]   ;;  %s3232_s6 = sld [smem:[#allocation37_spill]] }
  0x17   :  { %s58_s1 = sshll.u32 %s2919_s5, 4  ;;  %s3221_s7 = smov 64   ;;  %s59_s1 = int_to_ptr.vmem [resolvable:$true] %s58_s1 }
  0x18   :  { %s2921_s28 = smov 4   ;;  %s2922_s29 = smov [#allocation10]  }
  0x19   :  { %64 = dma.hbm_to_vmem [thread:$0]  %s57_s25, 8192, %s59_s1, [#allocation7], %s3221_s7, %s3221_s7, %s2921_s28  }
  0x1a   :  { %s93_s3 = sshll.u32 %s2922_s29, 4  ;;  %s125_s30 = sshll.u32 %s3208_s11, 4  ;;  %s94_s3 = int_to_ptr.vmem [resolvable:$true] %s93_s3  ;;  %s126_s30 = int_to_ptr.hbm [resolvable:$true] %s125_s30 }
  0x1b   :  { %s159_s26 = sshll.u32 %s3214_s17, 4  ;;  %s2923_s2 = smov [#allocation13]   ;;  %s160_s26 = int_to_ptr.hbm [resolvable:$true] %s159_s26 }
  0x1c   :  { %s91_s27 = sshll.u32 %s3232_s6, 4  ;;  %s127_s6 = sshll.u32 %s2923_s2, 4  ;;  %s92_s27 = int_to_ptr.hbm [resolvable:$true] %s91_s27  ;;  %s128_s6 = int_to_ptr.vmem [resolvable:$true] %s127_s6 }
  0x1d   :  { %99 = dma.hbm_to_vmem [thread:$0]  %s92_s27, 3072, %s94_s3, [#allocation11], %s3221_s7, %s3221_s7, %s2921_s28  }
  0x1e   :  { %133 = dma.hbm_to_vmem [thread:$0]  %s126_s30, 3072, %s128_s6, [#allocation14], %s3221_s7, %s3221_s7, %s2921_s28  }
  0x1f   :  { %s2924_s25 = smov [#allocation16]   ;;  %s3233_s0 = sld [smem:[#allocation33_spill]] }
  0x20   :  { %s161_s11 = sshll.u32 %s2924_s25, 4  ;;  %s2925_s17 = smov [#allocation2]   ;;  %s162_s11 = int_to_ptr.vmem [resolvable:$true] %s161_s11 }
  0x21   :  { %167 = dma.hbm_to_vmem [thread:$0]  %s160_s26, 1024, %s162_s11, [#allocation17], %s3221_s7, %s3221_s7, %s2921_s28  }
  0x22   :  { %s45_s27 = sshll.u32 %s2925_s17, 4  ;;  %s3234_s5 = sld [smem:[#allocation35_spill]]  ;;  %s46_s27 = int_to_ptr.vmem [resolvable:$true] %s45_s27 }
  0x23   :  { %s2926_s30 = smov 128   ;;  %s2927_s6 = smov 8  }
  0x24   :  { %s2928_s25 = smov [#allocation8]   ;;  %s2929_s11 = smov [#allocation9]  }
  0x25   :  { %s43_s4 = sshll.u32 %s3233_s0, 4  ;;  %s3235_s0 = sld [smem:[#allocation36_spill]]  ;;  %s44_s4 = int_to_ptr.hbm [resolvable:$true] %s43_s4 }
  0x26   :  { %51 = dma.hbm_to_vmem [thread:$0]  %s44_s4, 256, %s46_s27, [#allocation3], %s2926_s30, %s2926_s30, %s2927_s6  }
  0x27   :  { %s80_s17 = sshll.u32 %s2929_s11, 4  ;;  %s112_s24 = sshll.u32 %s3207_s10, 4  ;;  %s81_s17 = int_to_ptr.vmem [resolvable:$true] %s80_s17  ;;  %s113_s24 = int_to_ptr.hbm [resolvable:$true] %s112_s24 }
  0x28   :  { %s70_s2 = sshll.u32 %s3234_s5, 4  ;;  %s3236_s5 = smov 64   ;;  %s71_s2 = int_to_ptr.vmem [resolvable:$true] %s70_s2 }
  0x29   :  { %73 = dma.vmem_to_smem %s71_s2, 16, %s2928_s25, [#allocation5]  }
  0x2a   :  { %s2930_s4 = smov [#allocation12]   ;;  %s146_s1 = sshll.u32 %s3213_s16, 4  ;;  %s147_s1 = int_to_ptr.hbm [resolvable:$true] %s146_s1 }
  0x2b   :  { %s78_s26 = sshll.u32 %s3235_s0, 4  ;;  %s114_s27 = sshll.u32 %s2930_s4, 4  ;;  %s79_s26 = int_to_ptr.hbm [resolvable:$true] %s78_s26  ;;  %s115_s27 = int_to_ptr.vmem [resolvable:$true] %s114_s27 }
  0x2c   :  { %86 = dma.hbm_to_vmem [thread:$0]  %s79_s26, 3072, %s81_s17, [#allocation7], %s3236_s5, %s3236_s5, %s2921_s28  }
  0x2d   :  { %120 = dma.hbm_to_vmem [thread:$0]  %s113_s24, 3072, %s115_s27, [#allocation11], %s3236_s5, %s3236_s5, %s2921_s28  }
  0x2e   :  { %s174_s10 = sshll.u32 %s3216_s19, 4  ;;  %s2931_s0 = smov [#allocation15]   ;;  %s175_s10 = int_to_ptr.hbm [resolvable:$true] %s174_s10 }
  0x2f   :  { %s148_s11 = sshll.u32 %s2931_s0, 4  ;;  %s2932_s26 = smov [#allocation18]   ;;  %s149_s11 = int_to_ptr.vmem [resolvable:$true] %s148_s11 }
  0x30   :  { %154 = dma.hbm_to_vmem [thread:$0]  %s147_s1, 1024, %s149_s11, [#allocation14], %s3236_s5, %s3236_s5, %s2921_s28  }
  0x31   :  { %s176_s16 = sshll.u32 %s2932_s26, 4  ;;  %s177_s16 = int_to_ptr.vmem [resolvable:$true] %s176_s16 }
  0x32   :  { %182 = dma.hbm_to_vmem [thread:$0]  %s175_s10, 1024, %s177_s16, [#allocation17], %s3236_s5, %s3236_s5, %s2921_s28  }
  0x33   :  { %2901 = dma.done.wait [#allocation3], 256  }
  0x34   :  { %2902 = vsyncadd [#allocation3], 4294967040 }
  0x35   :  { %2903 = dma.done.wait [#allocation7], 8192  }
  0x36   :  { %2904 = vsyncadd [#allocation7], 4294959104 }
  0x37   :  { %2905 = dma.done.wait [#allocation5], 16  }
  0x38   :  { %2906 = vsyncadd [#allocation5], 4294967280 }
  0x39   :  { %2907 = dma.done.wait [#allocation7], 3072  }
  0x3a   :  { %2908 = vsyncadd [#allocation7], 4294964224 }
  0x3b   :  { %2909 = dma.done.wait [#allocation11], 6144  }
  0x3c   :  { %2910 = vsyncadd [#allocation11], 4294961152 }
  0x3d   :  { %2911 = dma.done.wait [#allocation14], 4096  }
  0x3e   :  { %2912 = vsyncadd [#allocation14], 4294963200 }
  0x3f   :  { %2913 = dma.done.wait [#allocation17], 2048  }
  0x40   :  { %2914 = vsyncadd [#allocation17], 4294965248 }
  0x41   :  { %225 = sfence }
  0x42   :  { %v2434_v0 = vld [vmem:[#allocation10 + $0x38] sm:$0xff]  ;;  %v2433_v4 = vld [vmem:[#allocation10 + $0x30] sm:$0xff]  ;;  %v2432_v8 = vld [vmem:[#allocation10 + $0x28] sm:$0xff]  ;;  %s3237_s17 = sld [smem:[#allocation32_spill]]  ;;  %s1812_s24 = sshll.u32 %s3219_s22, 4  ;;  %s1813_s24 = int_to_ptr.hbm [resolvable:$true] %s1812_s24 }
  0x43   :  { %v2442_v1 = vld [vmem:[#allocation10 + $0x78] sm:$0xff]  ;;  %343 = vmatpush.bf16.msra.mxu0 %v2434_v0  ;;  %v2441_v5 = vld [vmem:[#allocation10 + $0x70] sm:$0xff]  ;;  %v2440_v9 = vld [vmem:[#allocation10 + $0x68] sm:$0xff]  ;;  %s3238_s5 = sld [smem:[#allocation38_spill]]  ;;  %s1825_s1 = sshll.u32 %s3220_s23, 4  ;;  %s1826_s1 = int_to_ptr.hbm [resolvable:$true] %s1825_s1 }
  0x44   :  { %v2410_v2 = vld [vmem:[#allocation9 + $0x38] sm:$0xff]  ;;  %421 = vmatpush.bf16.msra.mxu1 %v2442_v1  ;;  %v2409_v6 = vld [vmem:[#allocation9 + $0x30] sm:$0xff]  ;;  %v2408_v10 = vld [vmem:[#allocation9 + $0x28] sm:$0xff]  ;;  %s3239_s2 = sld [smem:[#allocation39_spill]]  ;;  %s2936_s29 = smov 16  }
  0x45   :  { %v2418_v3 = vld [vmem:[#allocation9 + $0x78] sm:$0xff]  ;;  %499 = vmatpush.bf16.msra.mxu2 %v2410_v2  ;;  %v2417_v7 = vld [vmem:[#allocation9 + $0x70] sm:$0xff]  ;;  %v2416_v11 = vld [vmem:[#allocation9 + $0x68] sm:$0xff]  ;;  %s2937_s22 = smov 1   ;;  %s2938_s7 = smov [#allocation19]  }
  0x46   :  { %584 = vmatpush.bf16.msra.mxu3 %v2418_v3  ;;  %v2431_v12 = vld [vmem:[#allocation10 + $0x20] sm:$0xff]  ;;  %v2430_v16 = vld [vmem:[#allocation10 + $0x18] sm:$0xff]  ;;  %v2429_v20 = vld [vmem:[#allocation10 + $0x10] sm:$0xff] }
  0x47   :  { %344 = vmatpush.bf16.msra.mxu0 %v2433_v4  ;;  %v2439_v13 = vld [vmem:[#allocation10 + $0x60] sm:$0xff]  ;;  %v2438_v17 = vld [vmem:[#allocation10 + $0x58] sm:$0xff]  ;;  %v2437_v21 = vld [vmem:[#allocation10 + $0x50] sm:$0xff] }
  0x48   :  { %422 = vmatpush.bf16.msra.mxu1 %v2441_v5  ;;  %v2407_v14 = vld [vmem:[#allocation9 + $0x20] sm:$0xff]  ;;  %v2406_v18 = vld [vmem:[#allocation9 + $0x18] sm:$0xff]  ;;  %v2405_v22 = vld [vmem:[#allocation9 + $0x10] sm:$0xff] }
  0x49   :  { %500 = vmatpush.bf16.msra.mxu2 %v2409_v6  ;;  %v2415_v15 = vld [vmem:[#allocation9 + $0x60] sm:$0xff]  ;;  %v2414_v19 = vld [vmem:[#allocation9 + $0x58] sm:$0xff]  ;;  %v2413_v23 = vld [vmem:[#allocation9 + $0x50] sm:$0xff] }
  0x4a   :  { %585 = vmatpush.bf16.msra.mxu3 %v2417_v7  ;;  %v2428_v24 = vld [vmem:[#allocation10 + $0x8] sm:$0xff]  ;;  %v2427_v28 = vld [vmem:[#allocation10] sm:$0xff]  ;;  %v3116_v30 = vld [vmem:[#allocation2] sm:$0xff] }
  0x4b   :  { %345 = vmatpush.bf16.msra.mxu0 %v2432_v8  ;;  %v2436_v25 = vld [vmem:[#allocation10 + $0x48] sm:$0xff]  ;;  %v2435_v29 = vld [vmem:[#allocation10 + $0x40] sm:$0xff]  ;;  %v2450_v33 = vld [vmem:[#allocation10 + $0xb8] sm:$0xff]  ;;  %v228_v35 = vpack.c.bf16 %v3116_v30, %v3116_v30 }
  0x4c   :  { %423 = vmatpush.bf16.msra.mxu1 %v2440_v9  ;;  %v2404_v26 = vld [vmem:[#allocation9 + $0x8] sm:$0xff]  ;;  %v2403_v31 = vld [vmem:[#allocation9] sm:$0xff]  ;;  %v2426_v34 = vld [vmem:[#allocation9 + $0xb8] sm:$0xff] }
  0x4d   :  { %501 = vmatpush.bf16.msra.mxu2 %v2408_v10  ;;  %v2412_v27 = vld [vmem:[#allocation9 + $0x48] sm:$0xff]  ;;  %v2411_v32 = vld [vmem:[#allocation9 + $0x40] sm:$0xff]  ;;  %v226_v36 = vld [vmem:[%s3237_s17] sm:$0xf] }
  0x4e   :  { %586 = vmatpush.bf16.msra.mxu3 %v2416_v11  ;;  %v2482_v37 = vld [vmem:[#allocation13 + $0x38] sm:$0xff]  ;;  %v2449_v38 = vld [vmem:[#allocation10 + $0xb0] sm:$0xff]  ;;  %v2448_v40 = vld [vmem:[#allocation10 + $0xa8] sm:$0xff] }
  0x4f   :  { %346 = vmatpush.bf16.msra.mxu0 %v2431_v12  ;;  %v2425_v39 = vld [vmem:[#allocation9 + $0xb0] sm:$0xff]  ;;  %v2424_v41 = vld [vmem:[#allocation9 + $0xa8] sm:$0xff]  ;;  %v2447_v42 = vld [vmem:[#allocation10 + $0xa0] sm:$0xff] }
  0x50   :  { %424 = vmatpush.bf16.msra.mxu1 %v2439_v13  ;;  %v2423_v43 = vld [vmem:[#allocation9 + $0xa0] sm:$0xff]  ;;  %v2446_v44 = vld [vmem:[#allocation10 + $0x98] sm:$0xff]  ;;  %v2445_v46 = vld [vmem:[#allocation10 + $0x90] sm:$0xff] }
  0x51   :  { %502 = vmatpush.bf16.msra.mxu2 %v2407_v14  ;;  %v2422_v45 = vld [vmem:[#allocation9 + $0x98] sm:$0xff]  ;;  %v2421_v47 = vld [vmem:[#allocation9 + $0x90] sm:$0xff]  ;;  %v2444_v48 = vld [vmem:[#allocation10 + $0x88] sm:$0xff] }
  0x52   :  { %587 = vmatpush.bf16.msra.mxu3 %v2415_v15  ;;  %v2420_v49 = vld [vmem:[#allocation9 + $0x88] sm:$0xff]  ;;  %v2443_v50 = vld [vmem:[#allocation10 + $0x80] sm:$0xff]  ;;  %v2481_v52 = vld [vmem:[#allocation13 + $0x30] sm:$0xff] }
  0x53   :  { %347 = vmatpush.bf16.msra.mxu0 %v2430_v16  ;;  %v2419_v51 = vld [vmem:[#allocation9 + $0x80] sm:$0xff]  ;;  %v2480_v53 = vld [vmem:[#allocation13 + $0x28] sm:$0xff]  ;;  %v2478_v55 = vld [vmem:[#allocation13 + $0x18] sm:$0xff] }
  0x54   :  { %425 = vmatpush.bf16.msra.mxu1 %v2438_v17  ;;  %v2479_v54 = vld [vmem:[#allocation13 + $0x20] sm:$0xff]  ;;  %v2490_v56 = vld [vmem:[#allocation13 + $0x78] sm:$0xff]  ;;  %v2477_v57 = vld [vmem:[#allocation13 + $0x10] sm:$0xff] }
  0x55   :  { %503 = vmatpush.bf16.msra.mxu2 %v2406_v18  ;;  %v2489_v58 = vld [vmem:[#allocation13 + $0x70] sm:$0xff]  ;;  %v2476_v59 = vld [vmem:[#allocation13 + $0x8] sm:$0xff]  ;;  %v2475_v61 = vld [vmem:[#allocation13] sm:$0xff] }
  0x56   :  { %588 = vmatpush.bf16.msra.mxu3 %v2414_v19  ;;  %v2488_v60 = vld [vmem:[#allocation13 + $0x68] sm:$0xff]  ;;  %v2487_v62 = vld [vmem:[#allocation13 + $0x60] sm:$0xff]  ;;  %v2458_v63 = vld [vmem:[#allocation12 + $0x38] sm:$0xff] }
  0x57   :  { %348 = vmatpush.bf16.msra.mxu0 %v2429_v20  ;;  %v2466_v0 = vld [vmem:[#allocation12 + $0x78] sm:$0xff]  ;;  %v2457_v3 = vld [vmem:[#allocation12 + $0x30] sm:$0xff]  ;;  %v2456_v9 = vld [vmem:[#allocation12 + $0x28] sm:$0xff] }
  0x58   :  { %426 = vmatpush.bf16.msra.mxu1 %v2437_v21  ;;  %v2474_v1 = vld [vmem:[#allocation12 + $0xb8] sm:$0xff]  ;;  %v2465_v4 = vld [vmem:[#allocation12 + $0x70] sm:$0xff]  ;;  %v2464_v10 = vld [vmem:[#allocation12 + $0x68] sm:$0xff] }
  0x59   :  { %504 = vmatpush.bf16.msra.mxu2 %v2405_v22  ;;  %v2486_v2 = vld [vmem:[#allocation13 + $0x58] sm:$0xff]  ;;  %v2473_v5 = vld [vmem:[#allocation12 + $0xb0] sm:$0xff]  ;;  %v2472_v11 = vld [vmem:[#allocation12 + $0xa8] sm:$0xff] }
  0x5a   :  { %589 = vmatpush.bf16.msra.mxu3 %v2413_v23  ;;  %v2485_v8 = vld [vmem:[#allocation13 + $0x50] sm:$0xff]  ;;  %v2484_v12 = vld [vmem:[#allocation13 + $0x48] sm:$0xff]  ;;  %v2455_v13 = vld [vmem:[#allocation12 + $0x20] sm:$0xff] }
  0x5b   :  { %349 = vmatpush.bf16.msra.mxu0 %v2428_v24  ;;  %v2463_v14 = vld [vmem:[#allocation12 + $0x60] sm:$0xff]  ;;  %v2559_v15 = vld [vmem:[%s3238_s5] ss:$0 sm:$0xff]  ;;  %v3129_v20 = vld [vmem:[#allocation2 + $0x8] sm:$0xff]  ;;  %s2934_s5 = smov [#allocation20]  }
  0x5c   :  { %427 = vmatpush.bf16.msra.mxu1 %v2436_v25  ;;  %v2560_v16 = vld [vmem:[%s3239_s2] ss:$0 sm:$0xff]  ;;  %v2471_v17 = vld [vmem:[#allocation12 + $0xa0] sm:$0xff]  ;;  %v3133_v25 = vpack.c.bf16 %v3129_v20, %v3129_v20  ;;  %s1810_s4 = sshll.u32 %s2934_s5, 4  ;;  %s1811_s4 = int_to_ptr.vmem [resolvable:$true] %s1810_s4 }
  0x5d   :  { %505 = vmatpush.bf16.msra.mxu2 %v2404_v26  ;;  %v2483_v26 = vld [vmem:[#allocation13 + $0x40] sm:$0xff] }
  0x5e   :  { %590 = vmatpush.bf16.msra.mxu3 %v2412_v27  ;;  %v2454_v27 = vld [vmem:[#allocation12 + $0x18] sm:$0xff] }
  0x5f   :  { %350 = vmatpush.bf16.msra.mxu0 %v2427_v28  ;;  %v2462_v28 = vld [vmem:[#allocation12 + $0x58] sm:$0xff] }
  0x60   :  { %428 = vmatpush.bf16.msra.mxu1 %v2435_v29  ;;  %v2470_v29 = vld [vmem:[#allocation12 + $0x98] sm:$0xff] }
  0x61   :  { %506 = vmatpush.bf16.msra.mxu2 %v2403_v31 }
  0x62   :  { %591 = vmatpush.bf16.msra.mxu3 %v2411_v32  ;;  %351 = vmatmul.bf16.vlgmr.msra.gmra.mxu0 %v228_v35 }
  0x63   :  { %673 = vmatpush.bf16.msrb.mxu0 %v2426_v34  ;;  %429 = vmatmul.bf16.vlgmr.msra.gmra.mxu1 %v228_v35 }
  0x64   :  { %738 = vmatpush.bf16.msrb.mxu1 %v2450_v33  ;;  %507 = vmatmul.bf16.vlgmr.msra.gmra.mxu2 %v226_v36  ;;  %v2498_v33 = vld [vmem:[#allocation13 + $0xb8] sm:$0xff] }
  0x65   :  { %592 = vmatmul.bf16.vlgmr.msra.gmra.mxu3 %v226_v36  ;;  %877 = vmatpush.bf16.msrb.mxu2 %v2482_v37  ;;  %v2461_v37 = vld [vmem:[#allocation12 + $0x50] sm:$0xff] }
  0x66   :  { %955 = vmatpush.bf16.msrb.mxu3 %v2490_v56  ;;  %v2514_v56 = vld [vmem:[#allocation6 + $0x78] sm:$0xff] }
  0x67   :  { %674 = vmatpush.bf16.msrb.mxu0 %v2425_v39  ;;  %v2497_v39 = vld [vmem:[#allocation13 + $0xb0] sm:$0xff] }
  0x68   :  { %739 = vmatpush.bf16.msrb.mxu1 %v2449_v38  ;;  %v2469_v38 = vld [vmem:[#allocation12 + $0x90] sm:$0xff] }
  0x69   :  { %878 = vmatpush.bf16.msrb.mxu2 %v2481_v52 }
  0x6a   :  { %956 = vmatpush.bf16.msrb.mxu3 %v2489_v58 }
  0x6b   :  { %675 = vmatpush.bf16.msrb.mxu0 %v2424_v41 }
  0x6c   :  { %740 = vmatpush.bf16.msrb.mxu1 %v2448_v40 }
  0x6d   :  { %879 = vmatpush.bf16.msrb.mxu2 %v2480_v53 }
  0x6e   :  { %957 = vmatpush.bf16.msrb.mxu3 %v2488_v60 }
  0x6f   :  { %676 = vmatpush.bf16.msrb.mxu0 %v2423_v43  ;;  %v2460_v43 = vld [vmem:[#allocation12 + $0x48] sm:$0xff] }
  0x70   :  { %741 = vmatpush.bf16.msrb.mxu1 %v2447_v42  ;;  %v2452_v42 = vld [vmem:[#allocation12 + $0x8] sm:$0xff] }
  0x71   :  { %880 = vmatpush.bf16.msrb.mxu2 %v2479_v54  ;;  %v2494_v54 = vld [vmem:[#allocation13 + $0x98] sm:$0xff] }
  0x72   :  { %958 = vmatpush.bf16.msrb.mxu3 %v2487_v62 }
  0x73   :  { %677 = vmatpush.bf16.msrb.mxu0 %v2422_v45  ;;  %v2496_v45 = vld [vmem:[#allocation13 + $0xa8] sm:$0xff] }
  0x74   :  { %742 = vmatpush.bf16.msrb.mxu1 %v2446_v44  ;;  %v2468_v44 = vld [vmem:[#allocation12 + $0x88] sm:$0xff] }
  0x75   :  { %881 = vmatpush.bf16.msrb.mxu2 %v2478_v55  ;;  %v2506_v55 = vld [vmem:[#allocation6 + $0x38] sm:$0xff] }
  0x76   :  { %959 = vmatpush.bf16.msrb.mxu3 %v2486_v2  ;;  %v2492_v2 = vld [vmem:[#allocation13 + $0x88] sm:$0xff] }
  0x77   :  { %678 = vmatpush.bf16.msrb.mxu0 %v2421_v47  ;;  %v2459_v47 = vld [vmem:[#allocation12 + $0x40] sm:$0xff] }
  0x78   :  { %743 = vmatpush.bf16.msrb.mxu1 %v2445_v46  ;;  %v2451_v46 = vld [vmem:[#allocation12] sm:$0xff] }
  0x79   :  { %882 = vmatpush.bf16.msrb.mxu2 %v2477_v57  ;;  %v2493_v57 = vld [vmem:[#allocation13 + $0x90] sm:$0xff] }
  0x7a   :  { %960 = vmatpush.bf16.msrb.mxu3 %v2485_v8 }
  0x7b   :  { %679 = vmatpush.bf16.msrb.mxu0 %v2420_v49  ;;  %v2467_v49 = vld [vmem:[#allocation12 + $0x80] sm:$0xff] }
  0x7c   :  { %744 = vmatpush.bf16.msrb.mxu1 %v2444_v48 }
  0x7d   :  { %883 = vmatpush.bf16.msrb.mxu2 %v2476_v59 }
  0x7e   :  { %961 = vmatpush.bf16.msrb.mxu3 %v2484_v12 }
  0x7f   :  { %680 = vmatpush.bf16.msrb.mxu0 %v2419_v51 }
  0x80   :  { %745 = vmatpush.bf16.msrb.mxu1 %v2443_v50  ;;  %v2495_v50 = vld [vmem:[#allocation13 + $0xa0] sm:$0xff] }
  0x81   :  { %884 = vmatpush.bf16.msrb.mxu2 %v2475_v61 }
  0x82   :  { %681 = vmatmul.bf16.vlgmr.msrb.gmra.mxu0 %v226_v36  ;;  %962 = vmatpush.bf16.msrb.mxu3 %v2483_v26  ;;  %v2453_v36 = vld [vmem:[#allocation12 + $0x10] sm:$0xff] }
  0x83   :  { %746 = vmatmul.bf16.vlgmr.msrb.gmra.mxu1 %v228_v35  ;;  %1033 = vmatpush.bf16.msra.mxu0 %v2458_v63 }
  0x84   :  { %1118 = vmatpush.bf16.msra.mxu1 %v2466_v0  ;;  %885 = vmatmul.bf16.vlgmr.msrb.gmra.mxu2 %v3133_v25 }
  0x85   :  { %1207 = vmatpush.bf16.msra.mxu2 %v2474_v1  ;;  %963 = vmatmul.bf16.vlgmr.msrb.gmra.mxu3 %v3133_v25  ;;  %v2561_v1 = vld [vmem:[%s3206_s9] ss:$0 sm:$0xff] }
  0x86   :  { %1272 = vmatpush.bf16.msra.mxu3 %v2498_v33 }
  0x87   :  { %1034 = vmatpush.bf16.msra.mxu0 %v2457_v3 }
  0x88   :  { %1119 = vmatpush.bf16.msra.mxu1 %v2465_v4 }
  0x89   :  { %1208 = vmatpush.bf16.msra.mxu2 %v2473_v5 }
  0x8a   :  { %1273 = vmatpush.bf16.msra.mxu3 %v2497_v39  ;;  %v2504_v39 = vld [vmem:[#allocation6 + $0x28] sm:$0xff] }
  0x8b   :  { %1035 = vmatpush.bf16.msra.mxu0 %v2456_v9 }
  0x8c   :  { %1120 = vmatpush.bf16.msra.mxu1 %v2464_v10 }
  0x8d   :  { %1209 = vmatpush.bf16.msra.mxu2 %v2472_v11  ;;  %v2491_v11 = vld [vmem:[#allocation13 + $0x80] sm:$0xff] }
  0x8e   :  { %1274 = vmatpush.bf16.msra.mxu3 %v2496_v45 }
  0x8f   :  { %1036 = vmatpush.bf16.msra.mxu0 %v2455_v13 }
  0x90   :  { %1121 = vmatpush.bf16.msra.mxu1 %v2463_v14 }
  0x91   :  { %1210 = vmatpush.bf16.msra.mxu2 %v2471_v17 }
  0x92   :  { %1275 = vmatpush.bf16.msra.mxu3 %v2495_v50 }
  0x93   :  { %1037 = vmatpush.bf16.msra.mxu0 %v2454_v27 }
  0x94   :  { %1122 = vmatpush.bf16.msra.mxu1 %v2462_v28 }
  0x95   :  { %1211 = vmatpush.bf16.msra.mxu2 %v2470_v29 }
  0x96   :  { %1276 = vmatpush.bf16.msra.mxu3 %v2494_v54 }
  0x97   :  { %1038 = vmatpush.bf16.msra.mxu0 %v2453_v36  ;;  %v2513_v36 = vld [vmem:[#allocation6 + $0x70] sm:$0xff] }
  0x98   :  { %1123 = vmatpush.bf16.msra.mxu1 %v2461_v37 }
  0x99   :  { %1212 = vmatpush.bf16.msra.mxu2 %v2469_v38 }
  0x9a   :  { %1277 = vmatpush.bf16.msra.mxu3 %v2493_v57 }
  0x9b   :  { %1039 = vmatpush.bf16.msra.mxu0 %v2452_v42  ;;  %v2511_v42 = vld [vmem:[#allocation6 + $0x60] sm:$0xff] }
  0x9c   :  { %1124 = vmatpush.bf16.msra.mxu1 %v2460_v43  ;;  %v2502_v43 = vld [vmem:[#allocation6 + $0x18] sm:$0xff] }
  0x9d   :  { %1213 = vmatpush.bf16.msra.mxu2 %v2468_v44  ;;  %v2510_v44 = vld [vmem:[#allocation6 + $0x58] sm:$0xff] }
  0x9e   :  { %1278 = vmatpush.bf16.msra.mxu3 %v2492_v2 }
  0x9f   :  { %1040 = vmatpush.bf16.msra.mxu0 %v2451_v46  ;;  %v2501_v46 = vld [vmem:[#allocation6 + $0x10] sm:$0xff] }
  0xa0   :  { %1125 = vmatpush.bf16.msra.mxu1 %v2459_v47  ;;  %v2509_v47 = vld [vmem:[#allocation6 + $0x50] sm:$0xff] }
  0xa1   :  { %1214 = vmatpush.bf16.msra.mxu2 %v2467_v49  ;;  %v2564_v49 = vld [vmem:[%s3210_s13] ss:$0 sm:$0xff] }
  0xa2   :  { %1279 = vmatpush.bf16.msra.mxu3 %v2491_v11 }
  0xa3   :  { %1367 = vmatpush.bf16.xpose.msrb.mxu0 %v2506_v55 }
  0xa4   :  { %1400 = vmatpush.bf16.msrb.mxu1 %v2506_v55  ;;  %v2500_v55 = vld [vmem:[#allocation6 + $0x8] sm:$0xff] }
  0xa5   :  { %1490 = vmatpush.bf16.xpose.msrb.mxu2 %v2514_v56  ;;  %1280 = vmatmul.bf16.vlgmr.msra.gmra.mxu3 %v3133_v25 }
  0xa6   :  { %1521 = vmatpush.bf16.msrb.mxu3 %v2514_v56 }
  0xaa   :  { %1522 = vmatpush.bf16.msrb.mxu3 %v2513_v36 }
  0xad   :  { %1491 = vmatpush.bf16.xpose.msrb.mxu2 %v2513_v36 }
  0xdf   :  { %v352_v6 = vpop.f32.mrf.mxu0 }
  0xe0   :  { %v430_v7 = vpop.f32.mrf.mxu1 }
  0xe7   :  { %v508_v18 = vpop.f32.mrf.mxu2  ;;  %v354_v23 = vpop.f32.mrf.mxu0 }
  0xe8   :  { %v593_v19 = vpop.f32.mrf.mxu3  ;;  %v509_v21 = vadd.f32 %v508_v18, %v352_v6  ;;  %v432_v24 = vpop.f32.mrf.mxu1 }
  0xe9   :  { %v594_v22 = vadd.f32 %v593_v19, %v430_v7  ;;  %v2562_v7 = vld [vmem:[%s3205_s8] ss:$0 sm:$0xff]  ;;  %s1800_s8 = sshll.u32 %s2938_s7, 4  ;;  %s1801_s8 = int_to_ptr.vmem [resolvable:$true] %s1800_s8 }
  0xea   :  { %v516_v31 = vadd.f32 %v2559_v15, %v509_v21 }
  0xeb   :  { %v601_v32 = vadd.f32 %v2560_v16, %v594_v22 }
  0xec   :  { %v1948_v34 = vmul.f32 -1.442695, %v516_v31 }
  0xed   :  { %v1981_v35 = vmul.f32 -1.442695, %v601_v32 }
  0xee   :  { %2569 = vpow2.f32 %v1948_v34 }
  0xef   :  { %2571 = vpow2.f32 %v1981_v35  ;;  %v510_v40 = vpop.f32.mrf.mxu2  ;;  %v2505_v35 = vld [vmem:[#allocation6 + $0x30] sm:$0xff] }
  0xf0   :  { %v595_v41 = vpop.f32.mrf.mxu3  ;;  %1368 = vmatpush.bf16.xpose.msrb.mxu0 %v2505_v35  ;;  %1401 = vmatpush.bf16.msrb.mxu1 %v2505_v35 }
  0xf1   :  { %v2512_v41 = vld [vmem:[#allocation6 + $0x68] sm:$0xff] }
  0xf2   :  { %1492 = vmatpush.bf16.xpose.msrb.mxu2 %v2512_v41  ;;  %1523 = vmatpush.bf16.msrb.mxu3 %v2512_v41 }
  0xf4   :  { %v2570_v48 = vpop.eup %2569  ;;  %1402 = vmatpush.bf16.msrb.mxu1 %v2504_v39 }
  0xf5   :  { %v2572_v51 = vpop.eup %2571  ;;  %v520_v52 = vadd.f32 1.0, %v2570_v48  ;;  %v2563_v48 = vld [vmem:[%s3209_s12] ss:$0 sm:$0xff] }
  0xf6   :  { %v605_v53 = vadd.f32 1.0, %v2572_v51  ;;  %1524 = vmatpush.bf16.msrb.mxu3 %v2511_v42 }
  0xf7   :  { %2573 = vrcp.f32 %v520_v52  ;;  %v532_v4 = vand.u32 2147483648, %v520_v52  ;;  %v530_v6 = vand.u32 2147483647, %v520_v52  ;;  %vm526_vm1 = vweird.f32 %v520_v52 }
  0xf8   :  { %2575 = vrcp.f32 %v605_v53  ;;  %vm611_vm4 = vweird.f32 %v605_v53  ;;  %v617_v19 = vand.u32 2147483648, %v605_v53  ;;  %v615_v22 = vand.u32 2147483647, %v605_v53  ;;  %1369 = vmatpush.bf16.xpose.msrb.mxu0 %v2504_v39 }
  0xf9   :  { %v533_v12 = vor.u32 1.1754944e-38, %v532_v4  ;;  %vm531_vm3 = vcmp.eq.f32.partialorder %v530_v6, 8.507059e+37 }
  0xfa   :  { %v618_v26 = vor.u32 1.1754944e-38, %v617_v19  ;;  %vm616_vm7 = vcmp.eq.f32.partialorder %v615_v22, 8.507059e+37  ;;  %1493 = vmatpush.bf16.xpose.msrb.mxu2 %v2511_v42  ;;  %1525 = vmatpush.bf16.msrb.mxu3 %v2510_v44  ;;  %v1380_v42 = vlaneseq }
  0xfd   :  { %v2574_v58 = vpop.eup %2573 }
  0xfe   :  { %v2576_v59 = vpop.eup %2575  ;;  %v522_v60 = vmul.f32 %v2574_v58, %v520_v52  ;;  %vm527_vm0 = vweird.f32 %v2574_v58  ;;  %1526 = vmatpush.bf16.msrb.mxu3 %v2509_v47 }
  0xff   :  { %v682_v62 = vpop.f32.mrf.mxu0  ;;  %v607_v63 = vmul.f32 %v2576_v59, %v605_v53  ;;  %vm528_vm2 = vmor %vm526_vm1, %vm527_vm0  ;;  %vm612_vm5 = vweird.f32 %v2576_v59  ;;  %vm1386_vm1 = vcmask 1040384  }
 0x100   :  { %v747_v61 = vpop.f32.mrf.mxu1  ;;  %v523_v0 = vsub.f32 1.0, %v522_v60  ;;  %v683_v14 = vadd.f32 %v2562_v7, %v682_v62  ;;  %vm613_vm6 = vmor %vm611_vm4, %vm612_vm5 }
 0x101   :  { %v608_v3 = vsub.f32 1.0, %v607_v63  ;;  %v748_v10 = vadd.f32 %v2561_v1, %v747_v61  ;;  %v2499_v61 = vld [vmem:[#allocation6] sm:$0xff] }
 0x102   :  { %v524_v5 = vmul.f32 %v2574_v58, %v523_v0  ;;  %1494 = vmatpush.bf16.xpose.msrb.mxu2 %v2510_v44  ;;  %v2507_v1 = vld [vmem:[#allocation6 + $0x40] sm:$0xff]  ;;  %v1381_v44 = vand.u32 127, %v1380_v42 }
 0x103   :  { %v609_v8 = vmul.f32 %v2576_v59, %v608_v3 }
 0x104   :  { %v525_v9 = vadd.f32 %v2574_v58, %v524_v5 }
 0x105   :  { %v610_v18 = vadd.f32 %v2576_v59, %v609_v8 }
 0x106   :  { %v529_v13 = vsel %vm528_vm2, %v2574_v58, %v525_v9  ;;  %v2508_v58 = vld [vmem:[#allocation6 + $0x48] sm:$0xff] }
 0x107   :  { %v684_v16 = vpop.f32.mrf.mxu0  ;;  %v534_v17 = vsel %vm531_vm3, %v533_v12, %v529_v13  ;;  %v614_v24 = vsel %vm613_vm6, %v2576_v59, %v610_v18  ;;  %v886_v25 = vpop.f32.mrf.mxu2  ;;  %1527 = vmatpush.bf16.msrb.mxu3 %v2508_v58  ;;  %v2566_v12 = vld [vmem:[%s3212_s15] ss:$0 sm:$0xff]  ;;  %s1382_s15 = sld [smem:[#allocation8]] }
 0x108   :  { %v749_v15 = vpop.f32.mrf.mxu1  ;;  %v751_v21 = vmul.f32 %v748_v10, %v534_v17  ;;  %v619_v27 = vsel %vm616_vm7, %v618_v26, %v614_v24  ;;  %v964_v37 = vpop.f32.mrf.mxu3  ;;  %v2565_v18 = vld [vmem:[%s3211_s14] ss:$0 sm:$0xff]  ;;  %s2305_s14 = sld [smem:[#allocation8 + $0x1]] }
 0x109   :  { %v754_v28 = vsub.f32 1.0, %v619_v27  ;;  %v756_v32 = vmul.f32 %v619_v27, %v3116_v30  ;;  %v2503_v30 = vld [vmem:[#allocation6 + $0x20] sm:$0xff] }
 0x10a   :  { %v752_v23 = vadd.f32 %v751_v21, %v683_v14  ;;  %1370 = vmatpush.bf16.xpose.msrb.mxu0 %v2503_v30  ;;  %1403 = vmatpush.bf16.msrb.mxu1 %v2503_v30 }
 0x10b   :  { %1495 = vmatpush.bf16.xpose.msrb.mxu2 %v2509_v47  ;;  %1528 = vmatpush.bf16.msrb.mxu3 %v2507_v1 }
 0x10c   :  { %2577 = vtanh.f32 %v752_v23 }
 0x10e   :  { %1404 = vmatpush.bf16.msrb.mxu1 %v2502_v43 }
 0x10f   :  { %v888_v38 = vpop.f32.mrf.mxu2 }
 0x110   :  { %v966_v40 = vpop.f32.mrf.mxu3 }
 0x112   :  { %v2578_v29 = vpop.eup %2577  ;;  %1371 = vmatpush.bf16.xpose.msrb.mxu0 %v2502_v43  ;;  %1405 = vmatpush.bf16.msrb.mxu1 %v2501_v46  ;;  %v1504_v43 = vstv %s2305_s14 }
 0x113   :  { %v755_v31 = vmul.f32 %v2578_v29, %v754_v28  ;;  %1496 = vmatpush.bf16.xpose.msrb.mxu2 %v2508_v58  ;;  %vm1505_vm0 = vcmp.lt.s32.totalorder %v1381_v44, %v1504_v43 }
 0x115   :  { %v757_v33 = vadd.f32 %v756_v32, %v755_v31 }
 0x116   :  { %1406 = vmatpush.bf16.msrb.mxu1 %v2500_v55 }
 0x117   :  { %v759_v34 = vpack.c.bf16 %v757_v33, %v757_v33  ;;  %758 = vst [vmem:[#allocation20] sm:$0xff] %v757_v33 }
 0x119   :  { %1041 = vmatmul.bf16.vlgmr.msra.gmra.mxu0 %v759_v34  ;;  %1126 = vmatmul.bf16.vlgmr.msra.gmra.mxu1 %v759_v34 }
 0x11a   :  { %1215 = vmatmul.bf16.vlgmr.msra.gmra.mxu2 %v759_v34  ;;  %1372 = vmatpush.bf16.xpose.msrb.mxu0 %v2501_v46 }
 0x11b   :  { %1407 = vmatpush.bf16.msrb.mxu1 %v2499_v61  ;;  %1497 = vmatpush.bf16.xpose.msrb.mxu2 %v2507_v1  ;;  %v2520_v1 = vld [vmem:[#allocation15 + $0x28] sm:$0xff] }
 0x122   :  { %1373 = vmatpush.bf16.xpose.msrb.mxu0 %v2500_v55 }
 0x128   :  { %v1281_v45 = vpop.f32.mrf.mxu3 }
 0x129   :  { %v1282_v21 = vadd.f32 %v2566_v12, %v1281_v45 }
 0x12a   :  { %1374 = vmatpush.bf16.xpose.msrb.mxu0 %v2499_v61 }
 0x130   :  { %v1283_v54 = vpop.f32.mrf.mxu3 }
 0x196   :  { %v1042_v50 = vpop.f32.mrf.mxu0  ;;  %v1127_v51 = vpop.f32.mrf.mxu1 }
 0x197   :  { %v1043_v52 = vadd.f32 %v1042_v50, %v886_v25  ;;  %v1128_v53 = vadd.f32 %v1127_v51, %v964_v37 }
 0x199   :  { %v1050_v56 = vadd.f32 %v2563_v48, %v1043_v52  ;;  %v1135_v57 = vadd.f32 %v2564_v49, %v1128_v53  ;;  %v2522_v52 = vld [vmem:[#allocation15 + $0x38] sm:$0xff]  ;;  %v2933_v53 = vmov 0.0  }
 0x19a   :  { %1295 = vst [vmem:[#allocation22 + $0x1] sm:$0x1] %v2933_v53  ;;  %1682 = vmatpush.bf16.msra.mxu3 %v2522_v52 }
 0x19b   :  { %v2142_v59 = vmul.f32 -1.442695, %v1050_v56  ;;  %v2175_v60 = vmul.f32 -1.442695, %v1135_v57  ;;  %1294 = vst [vmem:[#allocation22] sm:$0x1] %v2933_v53 }
 0x19c   :  { %1296 = vst [vmem:[#allocation22 + $0x2] sm:$0x1] %v2933_v53 }
 0x19d   :  { %2579 = vpow2.f32 %v2142_v59  ;;  %v1216_v62 = vpop.f32.mrf.mxu2  ;;  %1297 = vst [vmem:[#allocation22 + $0x3] sm:$0x1] %v2933_v53 }
 0x19e   :  { %2581 = vpow2.f32 %v2175_v60  ;;  %v1044_v63 = vpop.f32.mrf.mxu0  ;;  %v1129_v0 = vpop.f32.mrf.mxu1  ;;  %v1217_v27 = vadd.f32 %v2565_v18, %v1216_v62  ;;  %1298 = vst [vmem:[#allocation22 + $0x4] sm:$0x1] %v2933_v53 }
 0x19f   :  { %1299 = vst [vmem:[#allocation22 + $0x5] sm:$0x1] %v2933_v53  ;;  %v2521_v0 = vld [vmem:[#allocation15 + $0x30] sm:$0xff] }
 0x1a0   :  { %1300 = vst [vmem:[#allocation22 + $0x6] sm:$0x1] %v2933_v53  ;;  %1683 = vmatpush.bf16.msra.mxu3 %v2521_v0 }
 0x1a1   :  { %1301 = vst [vmem:[#allocation22 + $0x7] sm:$0x1] %v2933_v53 }
 0x1a3   :  { %v2580_v2 = vpop.eup %2579 }
 0x1a4   :  { %v2582_v3 = vpop.eup %2581  ;;  %v1054_v4 = vadd.f32 1.0, %v2580_v2  ;;  %1684 = vmatpush.bf16.msra.mxu3 %v2520_v1  ;;  %v2519_v2 = vld [vmem:[#allocation15 + $0x20] sm:$0xff] }
 0x1a5   :  { %v1139_v5 = vadd.f32 1.0, %v2582_v3  ;;  %v1218_v6 = vpop.f32.mrf.mxu2  ;;  %v2518_v3 = vld [vmem:[#allocation15 + $0x18] sm:$0xff] }
 0x1a6   :  { %2583 = vrcp.f32 %v1054_v4  ;;  %v1066_v14 = vand.u32 2147483648, %v1054_v4  ;;  %v1064_v16 = vand.u32 2147483647, %v1054_v4  ;;  %vm1060_vm9 = vweird.f32 %v1054_v4  ;;  %v2515_v6 = vld [vmem:[#allocation15] sm:$0xff] }
 0x1a7   :  { %2585 = vrcp.f32 %v1139_v5  ;;  %v1151_v29 = vand.u32 2147483648, %v1139_v5  ;;  %vm1145_vm13 = vweird.f32 %v1139_v5  ;;  %v1149_v31 = vand.u32 2147483647, %v1139_v5 }
 0x1a8   :  { %v1067_v22 = vor.u32 1.1754944e-38, %v1066_v14  ;;  %vm1065_vm11 = vcmp.eq.f32.partialorder %v1064_v16, 8.507059e+37  ;;  %1685 = vmatpush.bf16.msra.mxu3 %v2519_v2  ;;  %v2526_v16 = vld [vmem:[#allocation16 + $0x18] sm:$0xff] }
 0x1a9   :  { %v1152_v34 = vor.u32 1.1754944e-38, %v1151_v29  ;;  %vm1150_vm15 = vcmp.eq.f32.partialorder %v1149_v31, 8.507059e+37 }
 0x1ac   :  { %v2584_v7 = vpop.eup %2583  ;;  %1686 = vmatpush.bf16.msra.mxu3 %v2518_v3 }
 0x1ad   :  { %v2586_v8 = vpop.eup %2585  ;;  %v1056_v9 = vmul.f32 %v2584_v7, %v1054_v4  ;;  %vm1061_vm8 = vweird.f32 %v2584_v7  ;;  %v2517_v4 = vld [vmem:[#allocation15 + $0x10] sm:$0xff] }
 0x1ae   :  { %v1141_v10 = vmul.f32 %v2586_v8, %v1139_v5  ;;  %vm1062_vm10 = vmor %vm1060_vm9, %vm1061_vm8  ;;  %vm1146_vm12 = vweird.f32 %v2586_v8  ;;  %v2516_v5 = vld [vmem:[#allocation15 + $0x8] sm:$0xff] }
 0x1af   :  { %v1057_v11 = vsub.f32 1.0, %v1056_v9  ;;  %vm1147_vm14 = vmor %vm1145_vm13, %vm1146_vm12 }
 0x1b0   :  { %v1142_v13 = vsub.f32 1.0, %v1141_v10  ;;  %1687 = vmatpush.bf16.msra.mxu3 %v2517_v4  ;;  %v2528_v10 = vld [vmem:[#allocation16 + $0x28] sm:$0xff] }
 0x1b1   :  { %v1058_v15 = vmul.f32 %v2584_v7, %v1057_v11  ;;  %v2527_v11 = vld [vmem:[#allocation16 + $0x20] sm:$0xff] }
 0x1b2   :  { %v1143_v17 = vmul.f32 %v2586_v8, %v1142_v13 }
 0x1b3   :  { %v1059_v19 = vadd.f32 %v2584_v7, %v1058_v15 }
 0x1b4   :  { %v1144_v26 = vadd.f32 %v2586_v8, %v1143_v17  ;;  %1688 = vmatpush.bf16.msra.mxu3 %v2516_v5 }
 0x1b5   :  { %v1063_v23 = vsel %vm1062_vm10, %v2584_v7, %v1059_v19  ;;  %v2530_v7 = vld [vmem:[#allocation16 + $0x38] sm:$0xff] }
 0x1b6   :  { %v1068_v24 = vsel %vm1065_vm11, %v1067_v22, %v1063_v23  ;;  %v1148_v33 = vsel %vm1147_vm14, %v2586_v8, %v1144_v26  ;;  %1621 = vmatpush.bf16.msra.mxu1 %v2530_v7  ;;  %v2529_v8 = vld [vmem:[#allocation16 + $0x30] sm:$0xff]  ;;  %v2524_v22 = vld [vmem:[#allocation16 + $0x8] sm:$0xff]  ;;  %v2523_v23 = vld [vmem:[#allocation16] sm:$0xff] }
 0x1b7   :  { %v1285_v28 = vmul.f32 %v1282_v21, %v1068_v24  ;;  %v1153_v35 = vsel %vm1150_vm15, %v1152_v34, %v1148_v33  ;;  %v2525_v21 = vld [vmem:[#allocation16 + $0x10] sm:$0xff]  ;;  %v2538_v24 = vld [vmem:[#allocation18 + $0x38] sm:$0xff] }
 0x1b8   :  { %v1288_v36 = vsub.f32 1.0, %v1153_v35  ;;  %v1290_v38 = vmul.f32 %v1153_v35, %v3129_v20  ;;  %v1383_v20 = vstv %s1382_s15  ;;  %1689 = vmatpush.bf16.msra.mxu3 %v2515_v6  ;;  %1770 = vmatpush.bf16.msra.mxu0 %v2538_v24  ;;  %v2537_v26 = vld [vmem:[#allocation18 + $0x30] sm:$0xff]  ;;  %v2535_v35 = vld [vmem:[#allocation18 + $0x20] sm:$0xff] }
 0x1b9   :  { %v1286_v32 = vadd.f32 %v1285_v28, %v1217_v27  ;;  %vm1384_vm2 = vcmp.lt.s32.totalorder %v1381_v44, %v1383_v20  ;;  %v1414_v27 = vshrl.u32 %v1380_v42, 7  ;;  %v2536_v28 = vld [vmem:[#allocation18 + $0x28] sm:$0xff]  ;;  %v2533_v42 = vld [vmem:[#allocation18 + $0x10] sm:$0xff] }
 0x1ba   :  { %1622 = vmatpush.bf16.msra.mxu1 %v2529_v8  ;;  %v2567_v20 = vld [vmem:[%s3215_s18] ss:$0 sm:$0xff] }
 0x1bb   :  { %2587 = vtanh.f32 %v1286_v32  ;;  %vm1534_vm3 = vcmp.eq.s32.totalorder %v1414_v27, 1  ;;  %vm1415_vm4 = vcmp.eq.s32.totalorder %v1414_v27, 0 }
 0x1bc   :  { %1771 = vmatpush.bf16.msra.mxu0 %v2537_v26  ;;  %v2306_v32 = vsel %vm1534_vm3, 1.0, %v2933_v53  ;;  %v2272_v34 = vsel %vm1415_vm4, 1.0, %v2933_v53  ;;  %v2568_v53 = vld [vmem:[%s3217_s20] ss:$0 sm:$0xff]  ;;  %s2935_s20 = smov [#allocation22]  }
 0x1bd   :  { %s1823_s27 = sshll.u32 %s2935_s20, 4  ;;  %s1824_s27 = int_to_ptr.vmem [resolvable:$true] %s1823_s27 }
 0x1be   :  { %1623 = vmatpush.bf16.msra.mxu1 %v2528_v10 }
 0x1c0   :  { %1772 = vmatpush.bf16.msra.mxu0 %v2536_v28 }
 0x1c1   :  { %v2588_v25 = vpop.eup %2587 }
 0x1c2   :  { %v1289_v37 = vmul.f32 %v2588_v25, %v1288_v36  ;;  %1624 = vmatpush.bf16.msra.mxu1 %v2527_v11 }
 0x1c4   :  { %v1291_v39 = vadd.f32 %v1290_v38, %v1289_v37  ;;  %1773 = vmatpush.bf16.msra.mxu0 %v2535_v35  ;;  %v2534_v38 = vld [vmem:[#allocation18 + $0x18] sm:$0xff] }
 0x1c6   :  { %v3158_v40 = vpack.c.bf16 %v1291_v39, %v1291_v39  ;;  %1293 = vst [vmem:[#allocation20 + $0x8] sm:$0xff] %v1291_v39  ;;  %1625 = vmatpush.bf16.msra.mxu1 %v2526_v16 }
 0x1c7   :  { %1818 = dma.vmem_to_hbm [thread:$0]  %s1811_s4, 256, %s1813_s24, [#allocation21], %s2926_s30, %s2926_s30, %s2927_s6  }
 0x1c8   :  { %1375 = vmatmul.bf16.vlgmr.msrb.gmra.mxu0 %v3158_v40  ;;  %v1439_v41 = vshrl.u32 %v3158_v40, 16  ;;  %s1802_s30 = sshll.u32 %s3218_s21, 4  ;;  %s1803_s30 = int_to_ptr.hbm [resolvable:$true] %s1802_s30 }
 0x1c9   :  { %1774 = vmatpush.bf16.msra.mxu0 %v2534_v38 }
 0x1ca   :  { %1498 = vmatmul.bf16.vlgmr.msrb.gmra.mxu2 %v1439_v41  ;;  %1626 = vmatpush.bf16.msra.mxu1 %v2525_v21 }
 0x1cd   :  { %1775 = vmatpush.bf16.msra.mxu0 %v2533_v42 }
 0x1ce   :  { %1627 = vmatpush.bf16.msra.mxu1 %v2524_v22 }
 0x1d2   :  { %1628 = vmatpush.bf16.msra.mxu1 %v2523_v23 }
 0x245   :  { %v1376_v30 = vpop.f32.mrf.mxu0 }
 0x246   :  { %v1385_v49 = vsel %vm1384_vm2, %v1376_v30, -1e+30 }
 0x247   :  { %v1387_v51 = vsel %vm1386_vm1, %v1385_v49, -inf }
 0x24d   :  { %v1378_v45 = vpop.f32.mrf.mxu0  ;;  %v1499_v46 = vpop.f32.mrf.mxu2 }
 0x24e   :  { %v1506_v47 = vsel %vm1505_vm0, %v1499_v46, -1e+30  ;;  %v2532_v45 = vld [vmem:[#allocation18 + $0x8] sm:$0xff]  ;;  %v2531_v46 = vld [vmem:[#allocation18] sm:$0xff] }
 0x24f   :  { %v1507_v48 = vsel %vm1386_vm1, %v1506_v47, -inf  ;;  %1776 = vmatpush.bf16.msra.mxu0 %v2532_v45 }
 0x250   :  { %1508 = vmax.xlane.f32.xlu0 %v1507_v48 }
 0x253   :  { %1777 = vmatpush.bf16.msra.mxu0 %v2531_v46 }
 0x255   :  { %v1501_v50 = vpop.f32.mrf.mxu2 }
 0x258   :  { %1388 = vmax.xlane.f32.xlu0 %v1387_v51 }
 0x2c3   :  { %v1509_v54 = vpop.xlane.xlu0 %1508 }
 0x2c4   :  { %v1510_v55 = vsub.f32 %v1506_v47, %v1509_v54 }
 0x2c6   :  { %v1511_v56 = vmul.f32 1.442695, %v1510_v55 }
 0x2c8   :  { %2589 = vpow2.f32 %v1511_v56 }
 0x2cb   :  { %v1389_v57 = vpop.xlane.xlu0 %1388 }
 0x2cc   :  { %v1390_v58 = vsub.f32 %v1385_v49, %v1389_v57 }
 0x2ce   :  { %v2590_v59 = vpop.eup %2589  ;;  %v1391_v60 = vmul.f32 1.442695, %v1390_v58 }
 0x2cf   :  { %v1513_v61 = vsel %vm1386_vm1, %v2590_v59, 0.0 }
 0x2d0   :  { %2591 = vpow2.f32 %v1391_v60  ;;  %1514 = vadd.xlane.f32.xlu1 %v1513_v61 }
 0x2d6   :  { %v2592_v62 = vpop.eup %2591 }
 0x2d7   :  { %v1393_v63 = vsel %vm1386_vm1, %v2592_v62, 0.0 }
 0x2d8   :  { %1394 = vadd.xlane.f32.xlu1 %v1393_v63 }
 0x343   :  { %v1515_v9 = vpop.xlane.xlu1 %1514 }
 0x344   :  { %2593 = vrcp.f32 %v1515_v9 }
 0x34a   :  { %v2594_v12 = vpop.eup %2593 }
 0x34b   :  { %v1517_v13 = vmul.f32 %v2594_v12, %v2590_v59  ;;  %v1395_v14 = vpop.xlane.xlu1 %1394 }
 0x34c   :  { %2595 = vrcp.f32 %v1395_v14 }
 0x34d   :  { %1519 = vst [vmem:[#allocation22 + $0x1] sm:$0x1] %v1517_v13  ;;  %v1520_v15 = vpack.c.bf16 %v1517_v13, %v1517_v13 }
 0x34f   :  { %1529 = vmatmul.bf16.vlgmr.msrb.gmra.mxu3 %v1520_v15 }
 0x352   :  { %v2596_v17 = vpop.eup %2595 }
 0x353   :  { %v1397_v18 = vmul.f32 %v2596_v17, %v2592_v62 }
 0x355   :  { %1398 = vst [vmem:[#allocation22] sm:$0x1] %v1397_v18  ;;  %v1399_v19 = vpack.c.bf16 %v1397_v18, %v1397_v18 }
 0x356   :  { %1831 = dma.vmem_to_hbm [thread:$0]  %s1824_s27, 128, %s1826_s1, [#allocation21], %s2936_s29, %s2936_s29, %s2937_s22  }
 0x357   :  { %1408 = vmatmul.bf16.vlgmr.msrb.gmra.mxu1 %v1399_v19 }
 0x35f   :  { %1690 = vmatmul.bf16.vlgmr.msra.gmra.mxu3 %v3158_v40 }
 0x3d2   :  { %v1530_v29 = vpop.f32.mrf.mxu3 }
 0x3d3   :  { %v1537_v31 = vperm.slane %v1530_v29, 0 }
 0x3d4   :  { %v1409_v33 = vpop.f32.mrf.mxu1 }
 0x3d5   :  { %v1418_v36 = vperm.slane %v1409_v33, 0  ;;  %v1538_v25 = vmul.f32 %v2306_v32, %v1537_v31 }
 0x3d7   :  { %v1419_v37 = vmul.f32 %v2272_v34, %v1418_v36 }
 0x3d9   :  { %v1539_v39 = vadd.f32 %v1538_v25, %v1419_v37 }
 0x3da   :  { %v1532_v40 = vpop.f32.mrf.mxu3 }
 0x3db   :  { %v1556_v41 = vpack.c.bf16 %v1539_v39, %v1539_v39 }
 0x3dc   :  { %v1411_v30 = vpop.f32.mrf.mxu1 }
 0x3dd   :  { %1629 = vmatmul.bf16.vlgmr.msra.gmra.mxu1 %v1556_v41 }
 0x3e2   :  { %v1691_v43 = vpop.f32.mrf.mxu3 }
 0x3ea   :  { %v1693_v44 = vpop.f32.mrf.mxu3 }
 0x45a   :  { %v1630_v47 = vpop.f32.mrf.mxu1 }
 0x45b   :  { %v1692_v48 = vadd.f32 %v1691_v43, %v1630_v47 }
 0x45d   :  { %v1699_v49 = vadd.f32 %v2567_v20, %v1692_v48 }
 0x45f   :  { %v1700_v50 = vmax.f32 %v1699_v49, 0.0 }
 0x461   :  { %v1701_v51 = vpack.c.bf16 %v1700_v50, %v1700_v50 }
 0x462   :  { %v1632_v52 = vpop.f32.mrf.mxu1 }
 0x463   :  { %1778 = vmatmul.bf16.vlgmr.msra.gmra.mxu0 %v1701_v51 }
 0x4e0   :  { %v1779_v54 = vpop.f32.mrf.mxu0 }
 0x4e1   :  { %v1780_v55 = vadd.f32 %v2568_v53, %v1779_v54 }
 0x4e3   :  { %1783 = vmax.xlane.f32.xlu2 %v1780_v55 }
 0x4e8   :  { %v1781_v56 = vpop.f32.mrf.mxu0 }
 0x556   :  { %v1784_v57 = vpop.xlane.xlu2 %1783 }
 0x557   :  { %v1785_v58 = vsub.f32 %v1780_v55, %v1784_v57 }
 0x559   :  { %v1786_v59 = vmul.f32 1.442695, %v1785_v58 }
 0x55b   :  { %2597 = vpow2.f32 %v1786_v59 }
 0x561   :  { %v2598_v60 = vpop.eup %2597 }
 0x562   :  { %1788 = vadd.xlane.f32.xlu2 %v2598_v60 }
 0x5d5   :  { %v1789_v61 = vpop.xlane.xlu2 %1788 }
 0x5d6   :  { %2599 = vlog2.f32 %v1789_v61 }
 0x5dc   :  { %v2600_v62 = vpop.eup %2599 }
 0x5dd   :  { %v1791_v63 = vmul.f32 0.6931472, %v2600_v62 }
 0x5df   :  { %v1792_v0 = vadd.f32 %v1791_v63, %v1784_v57 }
 0x5e1   :  { %v1793_v1 = vsub.f32 %v1780_v55, %v1792_v0 }
 0x5e3   :  { %1794 = vst [vmem:[#allocation19] sm:$0xff] %v1793_v1 }
 0x5e4   :  { %1805 = dma.vmem_to_hbm [thread:$0]  %s1801_s8, 128, %s1803_s30, [#allocation4]  }
 0x5e5   :  { %2915 = dma.done.wait [#allocation4], 128  }
 0x5e6   :  { %2916 = vsyncadd [#allocation4], 4294967168 }
 0x5e7   :  { %2917 = dma.done.wait [#allocation21], 384  }
 0x5e8   :  { %2918 = vsyncadd [#allocation21], 4294966912 }
 0x5e9   :  { %1844 = vsyncpa [#allocation3], 1 }
 0x5ea   :  { %1845 = vsyncpa [#allocation7], 1 }
 0x5eb   :  { %1846 = vsyncpa [#allocation11], 1 }
 0x5ec   :  { %1847 = vsyncpa [#allocation14], 1 }
 0x5ed   :  { %1848 = vsyncpa [#allocation17], 1 }
 0x5ee   :  { %1849 = vsyncpa [#allocation4], 1 }
 0x5ef   :  { %1850 = vsyncpa [#allocation21], 1 }
 0x5f0   :  { %1851 = vsyncpa [#allocation5], 1 }

</bundles_post_ra>
